<compile_context>
chip_gen: v7x
topology: tpu7x:2x2x1
jax: 0.10.0
libtpu: 0.0.40
codegen_flags: <defaults>
</compile_context>

<pallas_src>
import functools

import numpy as np
import jax
import jax.numpy as jnp
from jax import lax
from jax.experimental import pallas as pl
from jax.experimental.pallas import tpu as pltpu


# ---------------------------------------------------------------------------
# Host-side constants (cached per shape).
# ---------------------------------------------------------------------------
@functools.lru_cache(maxsize=None)
def _adaptive_avg_pool_matrix(in_size: int, out_size: int) -> np.ndarray:
    """(in_size, out_size) matrix reproducing nn.AdaptiveAvgPool1d exactly."""
    m = np.zeros((in_size, out_size), dtype=np.float32)
    for i in range(out_size):
        start = (i * in_size) // out_size
        end = -((-(i + 1) * in_size) // out_size)          # ceil((i+1)*in/out)
        m[start:end, i] = 1.0 / (end - start)
    return m


@functools.lru_cache(maxsize=None)
def _base_grid(D: int, H: int, W: int) -> np.ndarray:
    """(3, D*H*W) f32 normalized (x, y, z) base coords of F.affine_grid with
    align_corners=False; output voxel o flattens (d, h, w) in C order."""
    dd, hh, ww = np.meshgrid(np.arange(D), np.arange(H), np.arange(W), indexing="ij")
    bx = (2.0 * ww + 1.0) / W - 1.0
    by = (2.0 * hh + 1.0) / H - 1.0
    bz = (2.0 * dd + 1.0) / D - 1.0
    return np.stack([bx, by, bz], 0).reshape(3, -1).astype(np.float32)


def _pick_tile(dhw: int, cap: int) -> int:
    """Output-voxel tile: the full row if small, otherwise the largest
    multiple-of-128 divisor of dhw that is <= cap."""
    if dhw <= cap:
        return dhw
    for t in range(cap - cap % 128, 127, -128):
        if dhw % t == 0:
            return t
    return dhw


# ---------------------------------------------------------------------------
# Kernels.
# ---------------------------------------------------------------------------
def _nearest_source_index(trans_ref, base_ref, *, D, H, W):
    """Affine-transform this tile's base grid with theta[b]; return the flat
    source index (1, T) int32 (unclamped) and the in-bounds mask (1, T)."""
    b = pl.program_id(0)
    x = base_ref[0:1, :]                      # (1, T) normalized coords
    y = base_ref[1:2, :]
    z = base_ref[2:3, :]
    # 12 theta scalars: SMEM reads hoisted out of the vector expressions.
    t = [trans_ref[b, k] for k in range(12)]
    xp = t[0] * x + t[1] * y + t[2] * z + t[3]
    yp = t[4] * x + t[5] * y + t[6] * z + t[7]
    zp = t[8] * x + t[9] * y + t[10] * z + t[11]
    # grid_sample unnormalization (align_corners=False) + nearest rounding
    # (round-half-to-even == PyTorch std::nearbyint); index math done in int32.
    ix = jnp.round(((xp + 1.0) * W - 1.0) * 0.5).astype(jnp.int32)
    iy = jnp.round(((yp + 1.0) * H - 1.0) * 0.5).astype(jnp.int32)
    iz = jnp.round(((zp + 1.0) * D - 1.0) * 0.5).astype(jnp.int32)
    inb = ((ix >= 0) & (ix < W) & (iy >= 0) & (iy < H) & (iz >= 0) & (iz < D))
    return iz * (H * W) + iy * W + ix, inb


def _grid_sample_gather_kernel(trans_ref, base_ref, x_ref, o_ref, *, C, D, H, W):
    """Preferred path: O(C*DHW) dynamic gather along the flattened-voxel axis."""
    flat, inb = _nearest_source_index(trans_ref, base_ref, D=D, H=H, W=W)
    idx = jnp.broadcast_to(jnp.where(inb, flat, 0), (C, flat.shape[-1]))
    vals = jnp.take_along_axis(x_ref[0], idx, axis=1, mode="promise_in_bounds")
    o_ref[0] = jnp.where(inb, vals, 0).astype(o_ref.dtype)


def _grid_sample_onehot_kernel(trans_ref, base_ref, x_ref, o_ref, *, C, D, H, W):
    """Fallback: one-hot-matmul gather, tiled along the output-voxel axis so
    scratch is O(DHW * TILE), never the full (DHW, DHW) matrix."""
    del C
    flat, inb = _nearest_source_index(trans_ref, base_ref, D=D, H=H, W=W)
    key = jnp.where(inb, flat, -1)                                   # -1: no match
    row = lax.broadcasted_iota(jnp.int32, (D * H * W, key.shape[-1]), 0)
    gdt = jnp.bfloat16 if x_ref.dtype == jnp.bfloat16 else jnp.float32
    gmat = (row == key).astype(gdt)                                  # (DHW, TILE)
    o_ref[0] = jnp.dot(x_ref[0].astype(gdt), gmat,
                       preferred_element_type=jnp.float32).astype(o_ref.dtype)


# ---------------------------------------------------------------------------
# Module wrapper.
# ---------------------------------------------------------------------------
class TransformHeadPallas:
    """coords=True / affine=True / dim=3 configuration of TransformHead."""

    def __init__(self, mid_size=512, dim=3, affine=True, coords=True, start_dim=0):
        assert coords and affine and dim == 3, "implemented config: coords/affine/dim=3"
        # TODO(synk): coords=False branch (bmm on raw coordinate channels) not implemented.
        self.mid_size = mid_size
        self.dim = dim
        self.ndim = dim + 1
        # nn.Linear(mid_size, dim*ndim): weight zeroed, bias = eye(dim, ndim).view(-1)
        # (deterministic, exactly as the PyTorch module's __init__).
        self.weight = jnp.zeros((dim * self.ndim, mid_size), jnp.float32)
        self.bias = jnp.eye(self.dim, self.ndim, dtype=jnp.float32).reshape(-1)
        self._use_gather = {}          # per (shape, dtype, tile) lowering probe

    # --- net: AdaptiveAvgPool1d -> ReLU -> Linear ----------------------------
    # A few kFLOP; plain jnp in the wrapper beats a kernel launch + the HBM
    # round-trip of the (B, 12) result (perf-review item).
    def _net(self, features):
        B = features.shape[0]
        feat = features.reshape(B, -1).astype(jnp.float32)
        pmat = jnp.asarray(_adaptive_avg_pool_matrix(feat.shape[1], self.mid_size))
        hidden = jnp.maximum(feat @ pmat, 0.0)
        return hidden @ self.weight.T + self.bias            # (B, dim*ndim)

    # --- affine_grid + grid_sample(nearest, zeros, align_corners=False) ------
    def _grid_sample(self, data_input, trans, *, tile_cap=1024):
        B, C, D, H, W = data_input.shape
        DHW = D * H * W
        tile = _pick_tile(DHW, tile_cap)
        n_tiles = DHW // tile
        x_flat = data_input.reshape(B, C, DHW)
        base = jnp.asarray(_base_grid(D, H, W))
        theta = trans.reshape(B, self.dim * self.ndim).astype(jnp.float32)

        def build(kernel_body):
            kern = functools.partial(kernel_body, C=C, D=D, H=H, W=W)
            return pl.pallas_call(
                kern,
                out_shape=jax.ShapeDtypeStruct((B, C, DHW), data_input.dtype),
                grid=(B, n_tiles),
                in_specs=[
                    # theta (B, 12): scalars read from SMEM each grid step.
                    pl.BlockSpec(memory_space=pltpu.MemorySpace.SMEM),
                    # batch-invariant base grid, tiled along the voxel axis.
                    pl.BlockSpec((3, tile), lambda b, t: (0, t)),
                    # Full source volume of batch b (any output voxel may read any
                    # source voxel); resident across the tile axis.
                    # NOTE: C=4 under-fills the 8-sublane vreg on this block; it is
                    # loaded once per batch (not per tile), so the waste is small.
                    pl.BlockSpec((1, C, DHW), lambda b, t: (b, 0, 0)),
                ],
                out_specs=pl.BlockSpec((1, C, tile), lambda b, t: (b, 0, t)),
                compiler_params=pltpu.CompilerParams(
                    dimension_semantics=("parallel", "parallel"),
                    vmem_limit_bytes=32 * 1024 * 1024),
            )(theta, base, x_flat)

        # Prefer the O(C*DHW) gather; if lax.gather -> dynamic_gather does not
        # lower for this shape on the running JAX/TPU, fall back to the tiled
        # one-hot matmul.  The probe runs eagerly once per configuration.
        key = (data_input.shape, str(data_input.dtype), tile)
        use_gather = self._use_gather.get(key)
        if use_gather is None:
            try:
                out = jax.block_until_ready(build(_grid_sample_gather_kernel))
                self._use_gather[key] = True
                return out.reshape(B, C, D, H, W)
            except Exception:
                self._use_gather[key] = False
                use_gather = False
        out = build(_grid_sample_gather_kernel if use_gather
                    else _grid_sample_onehot_kernel)
        return out.reshape(B, C, D, H, W)

    def __call__(self, data_input, features):
        return self._grid_sample(data_input, self._net(features))


# ---------------------------------------------------------------------------
# Pure-NumPy reference (F.affine_grid + F.grid_sample nearest/zeros/align=False).
# ---------------------------------------------------------------------------
def _reference_grid_sample_nearest(data, theta):
    B, C, D, H, W = data.shape
    base = _base_grid(D, H, W).astype(np.float64)              # (3, DHW)
    out = np.zeros((B, C, D * H * W), dtype=data.dtype)
    for b in range(B):
        t = theta[b].astype(np.float64)                        # (3, 4)
        coords = t[:, :3] @ base + t[:, 3:4]                   # (3, DHW): x', y', z'
        ix = np.rint(((coords[0] + 1.0) * W - 1.0) * 0.5).astype(np.int64)
        iy = np.rint(((coords[1] + 1.0) * H - 1.0) * 0.5).astype(np.int64)
        iz = np.rint(((coords[2] + 1.0) * D - 1.0) * 0.5).astype(np.int64)
        inb = (ix >= 0) & (ix < W) & (iy >= 0) & (iy < H) & (iz >= 0) & (iz < D)
        flat = np.where(inb, iz * H * W + iy * W + ix, 0)
        src = data[b].reshape(C, -1)
        out[b] = np.where(inb[None, :], src[:, flat], 0.0)
    return out.reshape(B, C, D, H, W)


if __name__ == "__main__":
    key = jax.random.PRNGKey(0)
    k1, k2 = jax.random.split(key)

    B, C, D, H, W = 2, 4, 8, 8, 8
    F_FEAT = 64
    MID = 32

    data_input = jax.random.normal(k1, (B, C, D, H, W), dtype=jnp.float32)
    features = jax.random.normal(k2, (B, F_FEAT), dtype=jnp.float32)

    head = TransformHeadPallas(mid_size=MID, dim=3, affine=True, coords=True)

    # 1) Full forward.  With the module's init (zero Linear weight, identity
    #    bias) the predicted affine is the identity, so nearest grid_sample
    #    must reproduce the input exactly.
    out = jax.block_until_ready(head(data_input, features))
    assert out.shape == data_input.shape
    assert jnp.allclose(out, data_input, atol=1e-6), "identity grid_sample mismatch"

    # 2) Non-identity affine vs. the NumPy reference (theta entries are dyadic,
    #    so f32 kernel math and f64 reference math round identically).
    theta = np.array(
        [[[0.875, 0.125, 0.0, 0.25],
          [-0.125, 0.75, 0.0625, -0.25],
          [0.0, -0.0625, 1.125, 0.125]],
         [[1.25, 0.0, 0.25, -0.375],
          [0.25, -0.875, 0.0, 0.125],
          [-0.0625, 0.125, 0.875, 0.5]]], dtype=np.float32)
    ref = _reference_grid_sample_nearest(np.asarray(data_input), theta)

    out2 = jax.block_until_ready(head._grid_sample(data_input, jnp.asarray(theta)))
    assert np.allclose(np.asarray(out2), ref, atol=1e-6), "affine grid_sample mismatch"

    # 3) Same, with a multi-tile grid over the output-voxel axis (exercises the
    #    second 'parallel' grid dimension used to feed both cores on v7x).
    out3 = jax.block_until_ready(
        head._grid_sample(data_input, jnp.asarray(theta), tile_cap=128))
    assert np.allclose(np.asarray(out3), ref, atol=1e-6), "tiled grid_sample mismatch"

    print("KERNEL_OK")
</pallas_src>

<mosaic_0001>
module attributes {stable_mosaic.version = 11 : i64} {
  func.func @_grid_sample_gather_kernel(%arg0: i32, %arg1: i32, %arg2: memref<2x12xf32, #tpu.memory_space<smem>>, %arg3: memref<3x512xf32, #tpu.memory_space<vmem>>, %arg4: memref<1x4x512xf32, #tpu.memory_space<vmem>>, %arg5: memref<1x4x512xf32, #tpu.memory_space<vmem>>) attributes {dimension_semantics = [#tpu.dimension_semantics<parallel>, #tpu.dimension_semantics<parallel>], iteration_bounds = array<i64: 2, 1>, scalar_prefetch = 0 : i64, scratch_operands = 0 : i64, tpu.core_type = #tpu.core_type<tc>, window_params = [{transform_indices = @transform_0, window_bounds = array<i64: 2, 12>}, {transform_indices = @transform_1, window_bounds = array<i64: 3, 512>}, {transform_indices = @transform_2, window_bounds = array<i64: 1, 4, 512>}, {transform_indices = @transform_3, window_bounds = array<i64: 1, 4, 512>}]} {
    %c0 = arith.constant 0 : index
    %c0_0 = arith.constant 0 : index
    %0 = vector.load %arg3[%c0, %c0_0] : memref<3x512xf32, #tpu.memory_space<vmem>>, vector<1x512xf32>
    %c1 = arith.constant 1 : index
    %c0_1 = arith.constant 0 : index
    %1 = vector.load %arg3[%c1, %c0_1] : memref<3x512xf32, #tpu.memory_space<vmem>>, vector<1x512xf32>
    %c2 = arith.constant 2 : index
    %c0_2 = arith.constant 0 : index
    %2 = vector.load %arg3[%c2, %c0_2] : memref<3x512xf32, #tpu.memory_space<vmem>>, vector<1x512xf32>
    %3 = arith.index_cast %arg0 : i32 to index
    %c0_3 = arith.constant 0 : index
    %4 = memref.load %arg2[%3, %c0_3] : memref<2x12xf32, #tpu.memory_space<smem>>
    %5 = arith.index_cast %arg0 : i32 to index
    %c1_4 = arith.constant 1 : index
    %6 = memref.load %arg2[%5, %c1_4] : memref<2x12xf32, #tpu.memory_space<smem>>
    %7 = arith.index_cast %arg0 : i32 to index
    %c2_5 = arith.constant 2 : index
    %8 = memref.load %arg2[%7, %c2_5] : memref<2x12xf32, #tpu.memory_space<smem>>
    %9 = arith.index_cast %arg0 : i32 to index
    %c3 = arith.constant 3 : index
    %10 = memref.load %arg2[%9, %c3] : memref<2x12xf32, #tpu.memory_space<smem>>
    %11 = arith.index_cast %arg0 : i32 to index
    %c4 = arith.constant 4 : index
    %12 = memref.load %arg2[%11, %c4] : memref<2x12xf32, #tpu.memory_space<smem>>
    %13 = arith.index_cast %arg0 : i32 to index
    %c5 = arith.constant 5 : index
    %14 = memref.load %arg2[%13, %c5] : memref<2x12xf32, #tpu.memory_space<smem>>
    %15 = arith.index_cast %arg0 : i32 to index
    %c6 = arith.constant 6 : index
    %16 = memref.load %arg2[%15, %c6] : memref<2x12xf32, #tpu.memory_space<smem>>
    %17 = arith.index_cast %arg0 : i32 to index
    %c7 = arith.constant 7 : index
    %18 = memref.load %arg2[%17, %c7] : memref<2x12xf32, #tpu.memory_space<smem>>
    %19 = arith.index_cast %arg0 : i32 to index
    %c8 = arith.constant 8 : index
    %20 = memref.load %arg2[%19, %c8] : memref<2x12xf32, #tpu.memory_space<smem>>
    %21 = arith.index_cast %arg0 : i32 to index
    %c9 = arith.constant 9 : index
    %22 = memref.load %arg2[%21, %c9] : memref<2x12xf32, #tpu.memory_space<smem>>
    %23 = arith.index_cast %arg0 : i32 to index
    %c10 = arith.constant 10 : index
    %24 = memref.load %arg2[%23, %c10] : memref<2x12xf32, #tpu.memory_space<smem>>
    %25 = arith.index_cast %arg0 : i32 to index
    %c11 = arith.constant 11 : index
    %26 = memref.load %arg2[%25, %c11] : memref<2x12xf32, #tpu.memory_space<smem>>
    %27 = vector.broadcast %4 : f32 to vector<1x512xf32>
    %28 = arith.mulf %27, %0 : vector<1x512xf32>
    %29 = vector.broadcast %6 : f32 to vector<1x512xf32>
    %30 = arith.mulf %29, %1 : vector<1x512xf32>
    %31 = arith.addf %28, %30 : vector<1x512xf32>
    %32 = vector.broadcast %8 : f32 to vector<1x512xf32>
    %33 = arith.mulf %32, %2 : vector<1x512xf32>
    %34 = arith.addf %31, %33 : vector<1x512xf32>
    %35 = vector.broadcast %10 : f32 to vector<1x512xf32>
    %36 = arith.addf %34, %35 : vector<1x512xf32>
    %37 = vector.broadcast %12 : f32 to vector<1x512xf32>
    %38 = arith.mulf %37, %0 : vector<1x512xf32>
    %39 = vector.broadcast %14 : f32 to vector<1x512xf32>
    %40 = arith.mulf %39, %1 : vector<1x512xf32>
    %41 = arith.addf %38, %40 : vector<1x512xf32>
    %42 = vector.broadcast %16 : f32 to vector<1x512xf32>
    %43 = arith.mulf %42, %2 : vector<1x512xf32>
    %44 = arith.addf %41, %43 : vector<1x512xf32>
    %45 = vector.broadcast %18 : f32 to vector<1x512xf32>
    %46 = arith.addf %44, %45 : vector<1x512xf32>
    %47 = vector.broadcast %20 : f32 to vector<1x512xf32>
    %48 = arith.mulf %47, %0 : vector<1x512xf32>
    %49 = vector.broadcast %22 : f32 to vector<1x512xf32>
    %50 = arith.mulf %49, %1 : vector<1x512xf32>
    %51 = arith.addf %48, %50 : vector<1x512xf32>
    %52 = vector.broadcast %24 : f32 to vector<1x512xf32>
    %53 = arith.mulf %52, %2 : vector<1x512xf32>
    %54 = arith.addf %51, %53 : vector<1x512xf32>
    %55 = vector.broadcast %26 : f32 to vector<1x512xf32>
    %56 = arith.addf %54, %55 : vector<1x512xf32>
    %cst = arith.constant 1.000000e+00 : f32
    %57 = vector.broadcast %cst : f32 to vector<1x512xf32>
    %58 = arith.addf %36, %57 : vector<1x512xf32>
    %cst_6 = arith.constant 8.000000e+00 : f32
    %59 = vector.broadcast %cst_6 : f32 to vector<1x512xf32>
    %60 = arith.mulf %58, %59 : vector<1x512xf32>
    %cst_7 = arith.constant 1.000000e+00 : f32
    %61 = vector.broadcast %cst_7 : f32 to vector<1x512xf32>
    %62 = arith.subf %60, %61 : vector<1x512xf32>
    %cst_8 = arith.constant 5.000000e-01 : f32
    %63 = vector.broadcast %cst_8 : f32 to vector<1x512xf32>
    %64 = arith.mulf %62, %63 : vector<1x512xf32>
    %65 = math.roundeven %64 : vector<1x512xf32>
    %66 = arith.fptosi %65 : vector<1x512xf32> to vector<1x512xi32>
    %cst_9 = arith.constant 1.000000e+00 : f32
    %67 = vector.broadcast %cst_9 : f32 to vector<1x512xf32>
    %68 = arith.addf %46, %67 : vector<1x512xf32>
    %cst_10 = arith.constant 8.000000e+00 : f32
    %69 = vector.broadcast %cst_10 : f32 to vector<1x512xf32>
    %70 = arith.mulf %68, %69 : vector<1x512xf32>
    %cst_11 = arith.constant 1.000000e+00 : f32
    %71 = vector.broadcast %cst_11 : f32 to vector<1x512xf32>
    %72 = arith.subf %70, %71 : vector<1x512xf32>
    %cst_12 = arith.constant 5.000000e-01 : f32
    %73 = vector.broadcast %cst_12 : f32 to vector<1x512xf32>
    %74 = arith.mulf %72, %73 : vector<1x512xf32>
    %75 = math.roundeven %74 : vector<1x512xf32>
    %76 = arith.fptosi %75 : vector<1x512xf32> to vector<1x512xi32>
    %cst_13 = arith.constant 1.000000e+00 : f32
    %77 = vector.broadcast %cst_13 : f32 to vector<1x512xf32>
    %78 = arith.addf %56, %77 : vector<1x512xf32>
    %cst_14 = arith.constant 8.000000e+00 : f32
    %79 = vector.broadcast %cst_14 : f32 to vector<1x512xf32>
    %80 = arith.mulf %78, %79 : vector<1x512xf32>
    %cst_15 = arith.constant 1.000000e+00 : f32
    %81 = vector.broadcast %cst_15 : f32 to vector<1x512xf32>
    %82 = arith.subf %80, %81 : vector<1x512xf32>
    %cst_16 = arith.constant 5.000000e-01 : f32
    %83 = vector.broadcast %cst_16 : f32 to vector<1x512xf32>
    %84 = arith.mulf %82, %83 : vector<1x512xf32>
    %85 = math.roundeven %84 : vector<1x512xf32>
    %86 = arith.fptosi %85 : vector<1x512xf32> to vector<1x512xi32>
    %c0_i32 = arith.constant 0 : i32
    %87 = vector.broadcast %c0_i32 : i32 to vector<1x512xi32>
    %88 = arith.cmpi sge, %66, %87 : vector<1x512xi32>
    %c8_i32 = arith.constant 8 : i32
    %89 = vector.broadcast %c8_i32 : i32 to vector<1x512xi32>
    %90 = arith.cmpi slt, %66, %89 : vector<1x512xi32>
    %91 = arith.andi %88, %90 : vector<1x512xi1>
    %c0_i32_17 = arith.constant 0 : i32
    %92 = vector.broadcast %c0_i32_17 : i32 to vector<1x512xi32>
    %93 = arith.cmpi sge, %76, %92 : vector<1x512xi32>
    %94 = arith.andi %91, %93 : vector<1x512xi1>
    %c8_i32_18 = arith.constant 8 : i32
    %95 = vector.broadcast %c8_i32_18 : i32 to vector<1x512xi32>
    %96 = arith.cmpi slt, %76, %95 : vector<1x512xi32>
    %97 = arith.andi %94, %96 : vector<1x512xi1>
    %c0_i32_19 = arith.constant 0 : i32
    %98 = vector.broadcast %c0_i32_19 : i32 to vector<1x512xi32>
    %99 = arith.cmpi sge, %86, %98 : vector<1x512xi32>
    %100 = arith.andi %97, %99 : vector<1x512xi1>
    %c8_i32_20 = arith.constant 8 : i32
    %101 = vector.broadcast %c8_i32_20 : i32 to vector<1x512xi32>
    %102 = arith.cmpi slt, %86, %101 : vector<1x512xi32>
    %103 = arith.andi %100, %102 : vector<1x512xi1>
    %c64_i32 = arith.constant 64 : i32
    %104 = vector.broadcast %c64_i32 : i32 to vector<1x512xi32>
    %105 = arith.muli %86, %104 : vector<1x512xi32>
    %c8_i32_21 = arith.constant 8 : i32
    %106 = vector.broadcast %c8_i32_21 : i32 to vector<1x512xi32>
    %107 = arith.muli %76, %106 : vector<1x512xi32>
    %108 = arith.addi %105, %107 : vector<1x512xi32>
    %109 = arith.addi %108, %66 : vector<1x512xi32>
    %c0_i32_22 = arith.constant 0 : i32
    %110 = vector.broadcast %c0_i32_22 : i32 to vector<1x512xi32>
    %111 = arith.select %103, %109, %110 : vector<1x512xi1>, vector<1x512xi32>
    %112 = vector.shape_cast %111 : vector<1x512xi32> to vector<1x512xi32>
    %113 = vector.broadcast %112 : vector<1x512xi32> to vector<4x512xi32>
    %c0_23 = arith.constant 0 : index
    %c0_24 = arith.constant 0 : index
    %c0_25 = arith.constant 0 : index
    %114 = vector.load %arg4[%c0_23, %c0_24, %c0_25] : memref<1x4x512xf32, #tpu.memory_space<vmem>>, vector<1x4x512xf32>
    %115 = vector.shape_cast %114 : vector<1x4x512xf32> to vector<4x512xf32>
    %116 = vector.shape_cast %113 : vector<4x512xi32> to vector<4x512x1xi32>
    %117 = vector.shape_cast %116 : vector<4x512x1xi32> to vector<4x512xi32>
    %118 = tpu.dynamic_gather %115[%117] in [1] : vector<4x512xf32>, vector<4x512xi32> -> vector<4x512xf32>
    %c0_i32_26 = arith.constant 0 : i32
    %119 = arith.sitofp %c0_i32_26 : i32 to f32
    %120 = vector.shape_cast %103 : vector<1x512xi1> to vector<1x512xi1>
    %121 = vector.broadcast %120 : vector<1x512xi1> to vector<4x512xi1>
    %122 = vector.broadcast %119 : f32 to vector<4x512xf32>
    %123 = arith.select %121, %118, %122 : vector<4x512xi1>, vector<4x512xf32>
    %c0_27 = arith.constant 0 : index
    %c0_28 = arith.constant 0 : index
    %c0_29 = arith.constant 0 : index
    %124 = vector.load %arg5[%c0_27, %c0_28, %c0_29] : memref<1x4x512xf32, #tpu.memory_space<vmem>>, vector<1x4x512xf32>
    %125 = vector.shape_cast %124 : vector<1x4x512xf32> to vector<4x512xf32>
    %126 = vector.shape_cast %123 : vector<4x512xf32> to vector<1x4x512xf32>
    tpu.vector_store %arg5[%c0_27, %c0_28, %c0_29], %126 {strides = array<i32>} : memref<1x4x512xf32, #tpu.memory_space<vmem>>, vector<1x4x512xf32>,
    return
  }
  func.func @transform_0(%arg0: i32, %arg1: i32) -> (i32, i32) {
    %c0_i32 = arith.constant 0 : i32
    %c0_i32_0 = arith.constant 0 : i32
    %c0_i32_1 = arith.constant 0 : i32
    return %c0_i32, %c0_i32_0 : i32, i32
  }
  func.func @transform_1(%arg0: i32, %arg1: i32) -> (i32, i32) {
    %c0_i32 = arith.constant 0 : i32
    %c0_i32_0 = arith.constant 0 : i32
    return %c0_i32, %arg1 : i32, i32
  }
  func.func @transform_2(%arg0: i32, %arg1: i32) -> (i32, i32, i32) {
    %c0_i32 = arith.constant 0 : i32
    %c0_i32_0 = arith.constant 0 : i32
    %c0_i32_1 = arith.constant 0 : i32
    return %arg0, %c0_i32, %c0_i32_0 : i32, i32, i32
  }
  func.func @transform_3(%arg0: i32, %arg1: i32) -> (i32, i32, i32) {
    %c0_i32 = arith.constant 0 : i32
    %c0_i32_0 = arith.constant 0 : i32
    return %arg0, %c0_i32, %arg1 : i32, i32, i32
  }
}

module attributes {stable_mosaic.version = 11 : i64} {
  func.func @_grid_sample_onehot_kernel(%arg0: i32, %arg1: i32, %arg2: memref<2x12xf32, #tpu.memory_space<smem>>, %arg3: memref<3x512xf32, #tpu.memory_space<vmem>>, %arg4: memref<1x4x512xf32, #tpu.memory_space<vmem>>, %arg5: memref<1x4x512xf32, #tpu.memory_space<vmem>>) attributes {dimension_semantics = [#tpu.dimension_semantics<parallel>, #tpu.dimension_semantics<parallel>], iteration_bounds = array<i64: 2, 1>, scalar_prefetch = 0 : i64, scratch_operands = 0 : i64, tpu.core_type = #tpu.core_type<tc>, window_params = [{transform_indices = @transform_0, window_bounds = array<i64: 2, 12>}, {transform_indices = @transform_1, window_bounds = array<i64: 3, 512>}, {transform_indices = @transform_2, window_bounds = array<i64: 1, 4, 512>}, {transform_indices = @transform_3, window_bounds = array<i64: 1, 4, 512>}]} {
    %c0 = arith.constant 0 : index
    %c0_0 = arith.constant 0 : index
    %0 = vector.load %arg3[%c0, %c0_0] : memref<3x512xf32, #tpu.memory_space<vmem>>, vector<1x512xf32>
    %c1 = arith.constant 1 : index
    %c0_1 = arith.constant 0 : index
    %1 = vector.load %arg3[%c1, %c0_1] : memref<3x512xf32, #tpu.memory_space<vmem>>, vector<1x512xf32>
    %c2 = arith.constant 2 : index
    %c0_2 = arith.constant 0 : index
    %2 = vector.load %arg3[%c2, %c0_2] : memref<3x512xf32, #tpu.memory_space<vmem>>, vector<1x512xf32>
    %3 = arith.index_cast %arg0 : i32 to index
    %c0_3 = arith.constant 0 : index
    %4 = memref.load %arg2[%3, %c0_3] : memref<2x12xf32, #tpu.memory_space<smem>>
    %5 = arith.index_cast %arg0 : i32 to index
    %c1_4 = arith.constant 1 : index
    %6 = memref.load %arg2[%5, %c1_4] : memref<2x12xf32, #tpu.memory_space<smem>>
    %7 = arith.index_cast %arg0 : i32 to index
    %c2_5 = arith.constant 2 : index
    %8 = memref.load %arg2[%7, %c2_5] : memref<2x12xf32, #tpu.memory_space<smem>>
    %9 = arith.index_cast %arg0 : i32 to index
    %c3 = arith.constant 3 : index
    %10 = memref.load %arg2[%9, %c3] : memref<2x12xf32, #tpu.memory_space<smem>>
    %11 = arith.index_cast %arg0 : i32 to index
    %c4 = arith.constant 4 : index
    %12 = memref.load %arg2[%11, %c4] : memref<2x12xf32, #tpu.memory_space<smem>>
    %13 = arith.index_cast %arg0 : i32 to index
    %c5 = arith.constant 5 : index
    %14 = memref.load %arg2[%13, %c5] : memref<2x12xf32, #tpu.memory_space<smem>>
    %15 = arith.index_cast %arg0 : i32 to index
    %c6 = arith.constant 6 : index
    %16 = memref.load %arg2[%15, %c6] : memref<2x12xf32, #tpu.memory_space<smem>>
    %17 = arith.index_cast %arg0 : i32 to index
    %c7 = arith.constant 7 : index
    %18 = memref.load %arg2[%17, %c7] : memref<2x12xf32, #tpu.memory_space<smem>>
    %19 = arith.index_cast %arg0 : i32 to index
    %c8 = arith.constant 8 : index
    %20 = memref.load %arg2[%19, %c8] : memref<2x12xf32, #tpu.memory_space<smem>>
    %21 = arith.index_cast %arg0 : i32 to index
    %c9 = arith.constant 9 : index
    %22 = memref.load %arg2[%21, %c9] : memref<2x12xf32, #tpu.memory_space<smem>>
    %23 = arith.index_cast %arg0 : i32 to index
    %c10 = arith.constant 10 : index
    %24 = memref.load %arg2[%23, %c10] : memref<2x12xf32, #tpu.memory_space<smem>>
    %25 = arith.index_cast %arg0 : i32 to index
    %c11 = arith.constant 11 : index
    %26 = memref.load %arg2[%25, %c11] : memref<2x12xf32, #tpu.memory_space<smem>>
    %27 = vector.broadcast %4 : f32 to vector<1x512xf32>
    %28 = arith.mulf %27, %0 : vector<1x512xf32>
    %29 = vector.broadcast %6 : f32 to vector<1x512xf32>
    %30 = arith.mulf %29, %1 : vector<1x512xf32>
    %31 = arith.addf %28, %30 : vector<1x512xf32>
    %32 = vector.broadcast %8 : f32 to vector<1x512xf32>
    %33 = arith.mulf %32, %2 : vector<1x512xf32>
    %34 = arith.addf %31, %33 : vector<1x512xf32>
    %35 = vector.broadcast %10 : f32 to vector<1x512xf32>
    %36 = arith.addf %34, %35 : vector<1x512xf32>
    %37 = vector.broadcast %12 : f32 to vector<1x512xf32>
    %38 = arith.mulf %37, %0 : vector<1x512xf32>
    %39 = vector.broadcast %14 : f32 to vector<1x512xf32>
    %40 = arith.mulf %39, %1 : vector<1x512xf32>
    %41 = arith.addf %38, %40 : vector<1x512xf32>
    %42 = vector.broadcast %16 : f32 to vector<1x512xf32>
    %43 = arith.mulf %42, %2 : vector<1x512xf32>
    %44 = arith.addf %41, %43 : vector<1x512xf32>
    %45 = vector.broadcast %18 : f32 to vector<1x512xf32>
    %46 = arith.addf %44, %45 : vector<1x512xf32>
    %47 = vector.broadcast %20 : f32 to vector<1x512xf32>
    %48 = arith.mulf %47, %0 : vector<1x512xf32>
    %49 = vector.broadcast %22 : f32 to vector<1x512xf32>
    %50 = arith.mulf %49, %1 : vector<1x512xf32>
    %51 = arith.addf %48, %50 : vector<1x512xf32>
    %52 = vector.broadcast %24 : f32 to vector<1x512xf32>
    %53 = arith.mulf %52, %2 : vector<1x512xf32>
    %54 = arith.addf %51, %53 : vector<1x512xf32>
    %55 = vector.broadcast %26 : f32 to vector<1x512xf32>
    %56 = arith.addf %54, %55 : vector<1x512xf32>
    %cst = arith.constant 1.000000e+00 : f32
    %57 = vector.broadcast %cst : f32 to vector<1x512xf32>
    %58 = arith.addf %36, %57 : vector<1x512xf32>
    %cst_6 = arith.constant 8.000000e+00 : f32
    %59 = vector.broadcast %cst_6 : f32 to vector<1x512xf32>
    %60 = arith.mulf %58, %59 : vector<1x512xf32>
    %cst_7 = arith.constant 1.000000e+00 : f32
    %61 = vector.broadcast %cst_7 : f32 to vector<1x512xf32>
    %62 = arith.subf %60, %61 : vector<1x512xf32>
    %cst_8 = arith.constant 5.000000e-01 : f32
    %63 = vector.broadcast %cst_8 : f32 to vector<1x512xf32>
    %64 = arith.mulf %62, %63 : vector<1x512xf32>
    %65 = math.roundeven %64 : vector<1x512xf32>
    %66 = arith.fptosi %65 : vector<1x512xf32> to vector<1x512xi32>
    %cst_9 = arith.constant 1.000000e+00 : f32
    %67 = vector.broadcast %cst_9 : f32 to vector<1x512xf32>
    %68 = arith.addf %46, %67 : vector<1x512xf32>
    %cst_10 = arith.constant 8.000000e+00 : f32
    %69 = vector.broadcast %cst_10 : f32 to vector<1x512xf32>
    %70 = arith.mulf %68, %69 : vector<1x512xf32>
    %cst_11 = arith.constant 1.000000e+00 : f32
    %71 = vector.broadcast %cst_11 : f32 to vector<1x512xf32>
    %72 = arith.subf %70, %71 : vector<1x512xf32>
    %cst_12 = arith.constant 5.000000e-01 : f32
    %73 = vector.broadcast %cst_12 : f32 to vector<1x512xf32>
    %74 = arith.mulf %72, %73 : vector<1x512xf32>
    %75 = math.roundeven %74 : vector<1x512xf32>
    %76 = arith.fptosi %75 : vector<1x512xf32> to vector<1x512xi32>
    %cst_13 = arith.constant 1.000000e+00 : f32
    %77 = vector.broadcast %cst_13 : f32 to vector<1x512xf32>
    %78 = arith.addf %56, %77 : vector<1x512xf32>
    %cst_14 = arith.constant 8.000000e+00 : f32
    %79 = vector.broadcast %cst_14 : f32 to vector<1x512xf32>
    %80 = arith.mulf %78, %79 : vector<1x512xf32>
    %cst_15 = arith.constant 1.000000e+00 : f32
    %81 = vector.broadcast %cst_15 : f32 to vector<1x512xf32>
    %82 = arith.subf %80, %81 : vector<1x512xf32>
    %cst_16 = arith.constant 5.000000e-01 : f32
    %83 = vector.broadcast %cst_16 : f32 to vector<1x512xf32>
    %84 = arith.mulf %82, %83 : vector<1x512xf32>
    %85 = math.roundeven %84 : vector<1x512xf32>
    %86 = arith.fptosi %85 : vector<1x512xf32> to vector<1x512xi32>
    %c0_i32 = arith.constant 0 : i32
    %87 = vector.broadcast %c0_i32 : i32 to vector<1x512xi32>
    %88 = arith.cmpi sge, %66, %87 : vector<1x512xi32>
    %c8_i32 = arith.constant 8 : i32
    %89 = vector.broadcast %c8_i32 : i32 to vector<1x512xi32>
    %90 = arith.cmpi slt, %66, %89 : vector<1x512xi32>
    %91 = arith.andi %88, %90 : vector<1x512xi1>
    %c0_i32_17 = arith.constant 0 : i32
    %92 = vector.broadcast %c0_i32_17 : i32 to vector<1x512xi32>
    %93 = arith.cmpi sge, %76, %92 : vector<1x512xi32>
    %94 = arith.andi %91, %93 : vector<1x512xi1>
    %c8_i32_18 = arith.constant 8 : i32
    %95 = vector.broadcast %c8_i32_18 : i32 to vector<1x512xi32>
    %96 = arith.cmpi slt, %76, %95 : vector<1x512xi32>
    %97 = arith.andi %94, %96 : vector<1x512xi1>
    %c0_i32_19 = arith.constant 0 : i32
    %98 = vector.broadcast %c0_i32_19 : i32 to vector<1x512xi32>
    %99 = arith.cmpi sge, %86, %98 : vector<1x512xi32>
    %100 = arith.andi %97, %99 : vector<1x512xi1>
    %c8_i32_20 = arith.constant 8 : i32
    %101 = vector.broadcast %c8_i32_20 : i32 to vector<1x512xi32>
    %102 = arith.cmpi slt, %86, %101 : vector<1x512xi32>
    %103 = arith.andi %100, %102 : vector<1x512xi1>
    %c64_i32 = arith.constant 64 : i32
    %104 = vector.broadcast %c64_i32 : i32 to vector<1x512xi32>
    %105 = arith.muli %86, %104 : vector<1x512xi32>
    %c8_i32_21 = arith.constant 8 : i32
    %106 = vector.broadcast %c8_i32_21 : i32 to vector<1x512xi32>
    %107 = arith.muli %76, %106 : vector<1x512xi32>
    %108 = arith.addi %105, %107 : vector<1x512xi32>
    %109 = arith.addi %108, %66 : vector<1x512xi32>
    %c-1_i32 = arith.constant -1 : i32
    %110 = vector.broadcast %c-1_i32 : i32 to vector<1x512xi32>
    %111 = arith.select %103, %109, %110 : vector<1x512xi1>, vector<1x512xi32>
    %112 = tpu.iota {dimensions = array<i32: 0>} : vector<512x512xi32>
    %113 = vector.broadcast %111 : vector<1x512xi32> to vector<512x512xi32>
    %114 = arith.cmpi eq, %112, %113 : vector<512x512xi32>
    %115 = arith.extui %114 : vector<512x512xi1> to vector<512x512xi32>
    %116 = arith.sitofp %115 : vector<512x512xi32> to vector<512x512xf32>
    %c0_22 = arith.constant 0 : index
    %c0_23 = arith.constant 0 : index
    %c0_24 = arith.constant 0 : index
    %117 = vector.load %arg4[%c0_22, %c0_23, %c0_24] : memref<1x4x512xf32, #tpu.memory_space<vmem>>, vector<1x4x512xf32>
    %118 = vector.shape_cast %117 : vector<1x4x512xf32> to vector<4x512xf32>
    %cst_25 = arith.constant dense<0.000000e+00> : vector<4x512xf32>
    %119 = tpu.matmul %118, %116, %cst_25 {dimension_numbers = #tpu.dot_dimension_numbers<[1], [0], [0], [1], [0, 0, 1, 1], [], []>} : vector<4x512xf32>, vector<512x512xf32>, vector<4x512xf32> -> vector<4x512xf32>
    %c0_26 = arith.constant 0 : index
    %c0_27 = arith.constant 0 : index
    %c0_28 = arith.constant 0 : index
    %120 = vector.load %arg5[%c0_26, %c0_27, %c0_28] : memref<1x4x512xf32, #tpu.memory_space<vmem>>, vector<1x4x512xf32>
    %121 = vector.shape_cast %120 : vector<1x4x512xf32> to vector<4x512xf32>
    %122 = vector.shape_cast %119 : vector<4x512xf32> to vector<1x4x512xf32>
    tpu.vector_store %arg5[%c0_26, %c0_27, %c0_28], %122 {strides = array<i32>} : memref<1x4x512xf32, #tpu.memory_space<vmem>>, vector<1x4x512xf32>,
    return
  }
  func.func @transform_0(%arg0: i32, %arg1: i32) -> (i32, i32) {
    %c0_i32 = arith.constant 0 : i32
    %c0_i32_0 = arith.constant 0 : i32
    %c0_i32_1 = arith.constant 0 : i32
    return %c0_i32, %c0_i32_0 : i32, i32
  }
  func.func @transform_1(%arg0: i32, %arg1: i32) -> (i32, i32) {
    %c0_i32 = arith.constant 0 : i32
    %c0_i32_0 = arith.constant 0 : i32
    return %c0_i32, %arg1 : i32, i32
  }
  func.func @transform_2(%arg0: i32, %arg1: i32) -> (i32, i32, i32) {
    %c0_i32 = arith.constant 0 : i32
    %c0_i32_0 = arith.constant 0 : i32
    %c0_i32_1 = arith.constant 0 : i32
    return %arg0, %c0_i32, %c0_i32_0 : i32, i32, i32
  }
  func.func @transform_3(%arg0: i32, %arg1: i32) -> (i32, i32, i32) {
    %c0_i32 = arith.constant 0 : i32
    %c0_i32_0 = arith.constant 0 : i32
    return %arg0, %c0_i32, %arg1 : i32, i32, i32
  }
}

</mosaic_0001>

<bundles_post_ra>
// kernel: tpu_custom_call.1
= control target key start
LH: loop header
LB: loop body
LE: loop exit
PB: predicated region body
PF: predicated region fallthrough
CT: control target
= control target key end

     0   :  { %s4556_s0 = inlined_call_operand.hbm [shape: f32[2,12], index: 0, kind: input, shape index: {}]   ;;  %s4557_s1 = inlined_call_operand.hbm [shape: f32[3,512], index: 1, kind: input, shape index: {}]   ;;  %s4558_s2 = inlined_call_operand.hbm [shape: f32[2,4,512], index: 2, kind: input, shape index: {}]   ;;  %s4559_s3 = inlined_call_operand.hbm [shape: f32[2,4,512], index: 3, kind: output, shape index: {}]  }
   0x1   :  { %4565 = sst [smem:[#allocation14_spill]] %s4556_s0 }
   0x2   :  { %4566 = sst [smem:[#allocation15_spill]] %s4557_s1 }
   0x3   :  { %4567 = sst [smem:[#allocation16_spill]] %s4558_s2 }
   0x4   :  { %8 = vsyncpa [#allocation5], 0 }
   0x5   :  { %9 = vsyncpa [#allocation3], 0 }
   0x6   :  { %10 = vsyncpa [#allocation8], 0 }
   0x7   :  { %12 = vsyncpa [#allocation8 + $0x1], 0 }
   0x8   :  { %13 = vsyncpa [#allocation4], 0 }
   0x9   :  { %15 = vsyncpa [#allocation4 + $0x1], 0  ;;  %s2682_s12 = smov 0   ;;  %s2684_s13 = smov 0  }
   0xa   :  { %s2686_s14 = smov 0   ;;  %s2688_s15 = smov 0  }
   0xb   :  { %s2690_s16 = smov 0   ;;  %s2692_s17 = smov 0  }
   0xc LB: > { %s1601_s18 = sadd.s32 4294967295, %s2655_s17   ;;  %s1602_s19 = sadd.s32 4294967294, %s2655_s17   ;;  %s2655_s17 = sphi %s2692_s17, %s21_s17   ;;  %s2651_s16 = sphi %s2690_s16, %s4753_s16   ;;  %s2647_s15 = sphi %s2688_s15, %s4752_s15   ;;  %s2643_s14 = sphi %s2686_s14, %s4751_s14   ;;  %s2639_s13 = sphi %s2684_s13, %s4750_s13   ;;  %s2635_s12 = sphi %s2682_s12, %s4749_s12  }
   0xd   : > { %p100_p0 = scmp.ne.s32.totalorder %s2639_s13, %s2635_s12  ;;  %p2716_p1 = scmp.eq.s32.totalorder %s1601_s18, 0 }
   0xe   : > { %p2720_p2 = scmp.eq.s32.totalorder %s1601_s18, 1  ;;  %p132_p3 = scmp.eq.s32.totalorder %s1602_s19, 1 }
   0xf   : > { %s4568_s20 = scalar_select %p2716_p1, 1, 0 }
  0x10   : > { %p2726_p4 = por %p2716_p1, %p100_p0  ;;  %p1603_p5 = scmp.ge.s32.totalorder %s2655_s17, 1 }
  0x11   : > { %p2731_p6 = por %p132_p3, %p100_p0  ;;  %p139_p7 = scmp.lt.s32.totalorder %s2655_s17, 3 }
  0x12   : > { %s4570_s22 = scalar_select %p2726_p4, 1, 0 }
  0x13   : > { %s4571_s23 = scalar_select %p2731_p6, 1, 0 }
  0x14   : > { %p2736_p8 = pnand %p1603_p5, %p139_p7  ;;  %s2657_s25 = smov [#allocation6]  }
  0x15   : > { %s164_s26 = sshll.u32 %s2657_s25, 4  ;;  %s33_s28 = sadd.s32 1, %s2651_s16  ;;  %s2743_s26 = int_to_ptr.vmem [resolvable:$true] %s164_s26 }
  0x16   : > { %s4572_s24 = scalar_select %p2736_p8, 1, 0 }
  0x17   : > { %p2419_p10 = pneg %p2736_p8  ;;  %p2754_p12 = scmp.ge.s32.totalorder %s33_s28, 2 }
  0x18   : > { %s4575_s0 = sld [smem:[#allocation14_spill]] }
  0x19   : > { %p2747_p11 = pnand %p2419_p10, %p2716_p1 }
  0x1b   : > { %p2496_p0 = pneg %p2747_p11 }
  0x1e   : > { %s2494_s5 = scalar_lea.hbm %s4575_s0, 32 }
  0x1f   : > { %p2495_p13 = scmp.ne.s32.totalorder %s4575_s0, %s2494_s5  ;;  %p2501_p7 = scmp.lt.u32.totalorder %s2494_s5, %s4575_s0 }
  0x21   : > { %p2497_p3 = pnand %p2496_p0, %p2495_p13 }
  0x23   : > { %p2498_p5 = pneg %p2497_p3 }
  0x25   : > { %p2503_p10 = pnand %p2501_p7, %p2498_p5 }
  0x27   : > { %2506 = shalt.err (!%p2503_p10)
}
  0x28   : > { %s2658_s10 = smov [#allocation2]   ;;  %s4576_s1 = sld [smem:[#allocation15_spill]] }
  0x29   : > { %2422 = dma.hbm_to_smem (!%p2747_p11), %s4575_s0, 32, %s2658_s10, [#allocation5]  }
  0x2e   : > { %s2507_s30 = scalar_lea.hbm %s4576_s1, 256 }
  0x2f   : > { %p2508_p13 = scmp.ne.s32.totalorder %s4576_s1, %s2507_s30  ;;  %p2514_p7 = scmp.lt.u32.totalorder %s2507_s30, %s4576_s1 }
  0x31   : > { %p2510_p3 = pnand %p2508_p13, %p2496_p0 }
  0x33   : > { %p2511_p5 = pneg %p2510_p3 }
  0x35   : > { %p2516_p10 = pnand %p2514_p7, %p2511_p5 }
  0x37   : > { %2519 = shalt.err (!%p2516_p10)
}
  0x38   : > { %s2520_s8 = scalar_lea.vmem %s2743_s26, 256  ;;  %p2528_p1 = scmp.lt.s32.totalorder %s2743_s26, %s2743_s26 }
  0x39   : > { %p2521_p9 = scmp.ne.s32.totalorder %s2743_s26, %s2520_s8  ;;  %p2529_p13 = scmp.lt.s32.totalorder %s2520_s8, %s2520_s8 }
  0x3b   : > { %p2523_p6 = pnand %p2521_p9, %p2496_p0  ;;  %p2530_p3 = por %p2529_p13, %p2528_p1 }
  0x3d   : > { %p2524_p4 = pneg %p2523_p6 }
  0x3f   : > { %p2531_p8 = pnand %p2530_p3, %p2524_p4 }
  0x41   : > { %2534 = shalt.err (!%p2531_p8)
}
  0x42   : > { %2425 = dma.hbm_to_vmem [thread:$0]  (!%p2747_p11), %s4576_s1, 256, %s2743_s26, [#allocation3]  }
  0x43   : > { %s4755_s28 = smov (%p2754_p12, %s33_s28), 0  ;;  %s87_s27 = sadd.s32 1, %s2643_s14 }
  0x44   : > { %p94_p1 = scmp.ne.s32.totalorder %s2643_s14, %s2639_s13  ;;  %s84_s11 = ssub.s32 %s2651_s16, %s4755_s28 }
  0x45   : > { %p95_p4 = scmp.eq.s32.totalorder %s2655_s17, 0  ;;  %p85_p6 = scmp.eq.s32.totalorder %s84_s11, 0 }
  0x46   : > { %p2816_p8 = por %p2720_p2, %p94_p1  ;;  %p2436_p0 = scmp.lt.s32.totalorder %s2655_s17, 2 }
  0x47   : > { %p96_p9 = por %p95_p4, %p94_p1  ;;  %s175_s26 = sand.u32 1, %s2643_s14  }
  0x48   : > { %s2822_s19 = scalar_select %p85_p6, %s2643_s14, %s87_s27  }
  0x49   : > { %s2136_s25 = sshll.u32 %s2651_s16, 8  ;;  %s1607_s29 = sshll.u32 %s175_s26, 4 }
  0x4a   : > { %s4578_s2 = sld [smem:[#allocation16_spill]]  ;;  %s179_s21 = scalar_lea.vmem [#allocation7], %s1607_s29 }
  0x4b   : > { %s187_s5 = sshll.u32 %s179_s21, 4  ;;  %p2831_p2 = pnand %p2436_p0, %p96_p9  ;;  %s2835_s5 = int_to_ptr.vmem [resolvable:$true] %s187_s5 }
  0x4c   : > { %s176_s8 = scalar_lea.sflag [#allocation8], %s175_s26 }
  0x4d   : > { %p2537_p12 = pneg %p2831_p2 }
  0x50   : > { %s2829_s6 = scalar_lea.hbm %s4578_s2, %s2136_s25  ;;  %s2540_s11 = scalar_lea.hbm %s4578_s2, 512 }
  0x51   : > { %s2535_s9 = scalar_lea.hbm %s2829_s6, 256  ;;  %p2541_p10 = scmp.lt.u32.totalorder %s2829_s6, %s4578_s2 }
  0x52   : > { %p2536_p11 = scmp.ne.s32.totalorder %s2829_s6, %s2535_s9  ;;  %p2542_p13 = scmp.lt.u32.totalorder %s2540_s11, %s2535_s9 }
  0x53   : > { %p2544_p1 = scmp.lt.u32.totalorder %s2535_s9, %s2829_s6 }
  0x54   : > { %p2538_p5 = pnand %p2537_p12, %p2536_p11  ;;  %p2543_p3 = por %p2542_p13, %p2541_p10 }
  0x56   : > { %p2539_p7 = pneg %p2538_p5  ;;  %p2545_p4 = por %p2544_p1, %p2543_p3 }
  0x58   : > { %p2546_p6 = pnand %p2545_p4, %p2539_p7 }
  0x5a   : > { %2549 = shalt.err (!%p2546_p6)
}
  0x5b   : > { %s2550_s26 = scalar_lea.vmem %s2835_s5, 256  ;;  %s2659_s30 = smov [#allocation7]  }
  0x5c   : > { %p2551_p9 = scmp.ne.s32.totalorder %s2835_s5, %s2550_s26  ;;  %s2555_s4 = sshll.u32 %s2659_s30, 4  ;;  %s2556_s4 = int_to_ptr.vmem [resolvable:$false] %s2555_s4 }
  0x5d   : > { %s2557_s21 = scalar_lea.vmem %s2556_s4, 512  ;;  %p2558_p5 = scmp.lt.s32.totalorder %s2835_s5, %s2556_s4 }
  0x5e   : > { %p2553_p0 = pnand %p2551_p9, %p2537_p12  ;;  %p2559_p10 = scmp.lt.s32.totalorder %s2557_s21, %s2550_s26 }
  0x60   : > { %p2554_p11 = pneg %p2553_p0  ;;  %p2560_p13 = por %p2559_p10, %p2558_p5 }
  0x62   : > { %p2561_p3 = pnand %p2560_p13, %p2554_p11 }
  0x64   : > { %2564 = shalt.err (!%p2561_p3)
}
  0x65   : > { %2429 = dma.hbm_to_vmem [thread:$0]  (!%p2831_p2), %s2829_s6, 256, %s2835_s5, %s176_s8  }
  0x66   : > { %p4580_p7 = scmp.ne.s32.totalorder %s4572_s24, 0 }
  0x67   : > { %p4581_p12 = scmp.ne.s32.totalorder (!%p4580_p7), %s4568_s20, 0 }
  0x68   : > { %196 = sbr.rel (%p4580_p7) target bundleno = 525 (0x20d), region = 32 }
  0x6f   : > { %2618 = dma.done.wait (%p4581_p12), [#allocation5], 32  }
  0x70   : > { %2620 = vsyncadd (%p4581_p12), [#allocation5], 4294967264 }
  0x71   : > { %2622 = dma.done.wait (%p4581_p12), [#allocation3], 256  }
  0x72   : > { %2624 = vsyncadd (%p4581_p12), [#allocation3], 4294967040  ;;  %s2873_s7 = sand.u32 1, %s2639_s13   ;;  %p4582_p2 = scmp.ne.s32.totalorder %s4570_s22, 0 }
  0x73   : > { %s4564_s24 = sshll.u32 %s2873_s7, 4  ;;  %s207_s6 = scalar_lea.sflag [#allocation8], %s2873_s7 }
  0x74   : > { %s2879_s5 = scalar_lea.vmem [#allocation7], %s4564_s24 }
  0x75   : > { %2626 = dma.done.wait (%p4582_p2), %s207_s6, 256  }
  0x76   : > { %2628 = vsyncadd (%p4582_p2), %s207_s6, 4294967040 }
  0x77   : > { %215 = sfence }
  0x78   : > { %s2886_s20 = sshll.u32 %s2647_s15, 7  ;;  %v1175_v0 = vld [vmem:[%s2879_s5] sm:$0xff]  ;;  %v326_v46 = vlaneseq }
  0x79   : > { %s242_s8 = sld [smem:[#allocation2 + %s2886_s20]]  ;;  %s243_s9 = sadd.s32 1, %s2886_s20  ;;  %v1179_v1 = vcombine.high %v1175_v0, %v1175_v0  ;;  %v236_v2 = vld [vmem:[#allocation6] ss:$4 sm:$0xf] }
  0x7a   : > { %s244_s10 = sld [smem:[#allocation2 + %s243_s9]]  ;;  %s245_s27 = sadd.s32 2, %s2886_s20  ;;  %v238_v3 = vld [vmem:[#allocation6 + $0x1] ss:$4 sm:$0xf]  ;;  %v2907_v50 = vshrl.u32 %v326_v46, 7 }
  0x7b   : > { %s246_s22 = sld [smem:[#allocation2 + %s245_s27]]  ;;  %s247_s11 = sadd.s32 3, %s2886_s20  ;;  %1247 = vmatprep.mubr.f32.mxu0 %v1179_v1  ;;  %1389 = vmatprep.mubr.f32.mxu1 %v1179_v1  ;;  %v240_v4 = vld [vmem:[#allocation6 + $0x2] ss:$4 sm:$0xf] }
  0x7c   : > { %s2893_s25 = sld [smem:[#allocation2 + %s247_s11]]  ;;  %s249_s29 = sadd.s32 4, %s2886_s20  ;;  %v328_v54 = vadd.s32 8, %v2907_v50  ;;  %v397_v55 = vsub.s32 1, %v2907_v50  ;;  %v405_v57 = vsub.s32 3, %v2907_v50  ;;  %v393_v58 = vsub.s32 0, %v2907_v50 }
  0x7d   : > { %s250_s26 = sld [smem:[#allocation2 + %s249_s29]]  ;;  %s251_s30 = sadd.s32 5, %s2886_s20  ;;  %v401_v59 = vsub.s32 2, %v2907_v50  ;;  %v2915_v60 = vadd.s32 16, %v2907_v50  ;;  %v2918_v61 = vadd.s32 24, %v2907_v50  ;;  %v2921_v62 = vadd.s32 32, %v2907_v50 }
  0x7e   : > { %s252_s4 = sld [smem:[#allocation2 + %s251_s30]]  ;;  %s253_s21 = sadd.s32 6, %s2886_s20  ;;  %v2924_v63 = vadd.s32 40, %v2907_v50  ;;  %v2927_v1 = vadd.s32 48, %v2907_v50  ;;  %v3194_v46 = vadd.s32 360, %v2907_v50 }
  0x7f   : > { %s254_s6 = sld [smem:[#allocation2 + %s253_s21]]  ;;  %s255_s9 = sadd.s32 7, %s2886_s20  ;;  %v265_v5 = vstv %s242_s8 }
  0x80   : > { %s2899_s27 = sld [smem:[#allocation2 + %s255_s9]]  ;;  %s257_s11 = sadd.s32 8, %s2886_s20  ;;  %v266_v6 = vmul.f32 %v265_v5, %v236_v2  ;;  %v267_v7 = vstv %s244_s10  ;;  %v2939_v5 = vadd.s32 80, %v2907_v50 }
  0x81   : > { %s258_s24 = sld [smem:[#allocation2 + %s257_s11]]  ;;  %s259_s0 = sadd.s32 9, %s2886_s20  ;;  %v268_v8 = vmul.f32 %v267_v7, %v238_v3  ;;  %v270_v9 = vstv %s246_s22  ;;  %v2945_v7 = vadd.s32 96, %v2907_v50 }
  0x82   : > { %s260_s29 = sld [smem:[#allocation2 + %s259_s0]]  ;;  %s261_s1 = sadd.s32 10, %s2886_s20  ;;  %v271_v10 = vmul.f32 %v270_v9, %v240_v4  ;;  %v273_v13 = vstv %s2893_s25  ;;  %v2948_v9 = vadd.s32 104, %v2907_v50 }
  0x83   : > { %s262_s30 = sld [smem:[#allocation2 + %s261_s1]]  ;;  %s263_s2 = sadd.s32 11, %s2886_s20  ;;  %v269_v11 = vadd.f32 %v268_v8, %v266_v6  ;;  %v275_v12 = vstv %s250_s26  ;;  %v2942_v6 = vadd.s32 88, %v2907_v50 }
  0x84   : > { %s264_s21 = sld [smem:[#allocation2 + %s263_s2]]  ;;  %v276_v14 = vmul.f32 %v275_v12, %v236_v2  ;;  %v277_v15 = vstv %s252_s4  ;;  %s2137_s0 = sshll.u32 %s2647_s15, 8 }
  0x85   : > { %v272_v16 = vadd.f32 %v271_v10, %v269_v11  ;;  %v278_v17 = vmul.f32 %v277_v15, %v238_v3  ;;  %v280_v18 = vstv %s254_s6  ;;  %v2951_v10 = vadd.s32 112, %v2907_v50  ;;  %s4746_s1 = sshll.u32 %s2873_s7, 4  ;;  %s4507_s8 = scalar_lea.hbm %s4559_s3, %s2137_s0 }
  0x86   : > { %v281_v19 = vmul.f32 %v280_v18, %v240_v4  ;;  %v283_v23 = vstv %s2899_s27  ;;  %v2954_v11 = vadd.s32 120, %v2907_v50  ;;  %v2971_v18 = vadd.s32 144, %v2907_v50  ;;  %s233_s2 = scalar_lea.vmem [#allocation9], %s4746_s1  ;;  %s1478_s15 = scalar_lea.sflag [#allocation4], %s2873_s7 }
  0x87   : > { %v274_v20 = vadd.f32 %v273_v13, %v272_v16  ;;  %v279_v21 = vadd.f32 %v278_v17, %v276_v14  ;;  %v285_v22 = vstv %s258_s24  ;;  %v2965_v16 = vadd.s32 128, %v2907_v50  ;;  %s1494_s24 = sshll.u32 %s233_s2, 4  ;;  %s2661_s22 = smov [#allocation9]   ;;  %s4509_s24 = int_to_ptr.vmem [resolvable:$true] %s1494_s24 }
  0x88   : > { %v286_v24 = vmul.f32 %v285_v22, %v236_v2  ;;  %v287_v25 = vstv %s260_s29  ;;  %v2930_v2 = vadd.s32 56, %v2907_v50  ;;  %v2968_v17 = vadd.s32 136, %v2907_v50  ;;  %s2565_s10 = scalar_lea.vmem %s4509_s24, 256  ;;  %s2569_s25 = sshll.u32 %s2661_s22, 4  ;;  %s2570_s25 = int_to_ptr.vmem [resolvable:$false] %s2569_s25 }
  0x89   : > { %v282_v26 = vadd.f32 %v281_v19, %v279_v21  ;;  %v288_v27 = vmul.f32 %v287_v25, %v238_v3  ;;  %v290_v28 = vstv %s262_s30  ;;  %v295_v29 = vadd.f32 1.0, %v274_v20  ;;  %p2566_p1 = scmp.ne.s32.totalorder %s4509_s24, %s2565_s10  ;;  %s2571_s26 = scalar_lea.vmem %s2570_s25, 512 }
  0x8a   : > { %v291_v30 = vmul.f32 %v290_v28, %v240_v4  ;;  %v293_v34 = vstv %s264_s21  ;;  %v2933_v3 = vadd.s32 64, %v2907_v50  ;;  %v2936_v4 = vadd.s32 72, %v2907_v50  ;;  %p2572_p9 = scmp.lt.s32.totalorder %s4509_s24, %s2570_s25  ;;  %p2573_p0 = scmp.lt.s32.totalorder %s2571_s26, %s2565_s10 }
  0x8b   : > { %v284_v31 = vadd.f32 %v283_v23, %v282_v26  ;;  %v289_v32 = vadd.f32 %v288_v27, %v286_v24  ;;  %v296_v33 = vmul.f32 8.0, %v295_v29  ;;  %v2974_v19 = vadd.s32 152, %v2907_v50  ;;  %p2567_p4 = pnand %p2566_p1, %p2816_p8 }
  0x8c   : > { %v2660_v20 = vmov 1.0|1.0   ;;  %v2994_v21 = vadd.s32 160, %v2907_v50  ;;  %v2997_v22 = vadd.s32 168, %v2907_v50  ;;  %v3005_v23 = vadd.s32 176, %v2907_v50  ;;  %p2574_p11 = por %p2573_p0, %p2572_p9 }
  0x8d   : > { %v292_v35 = vadd.f32 %v291_v30, %v289_v32  ;;  %v1616_v36 = vadd.f32 -1.0, %v296_v33  ;;  %v300_v37 = vadd.f32 1.0, %v284_v31  ;;  %v3008_v24 = vadd.s32 184, %v2907_v50  ;;  %p2568_p6 = pneg %p2567_p4 }
  0x8e   : > { %v3021_v25 = vadd.s32 192, %v2907_v50  ;;  %v3024_v26 = vadd.s32 200, %v2907_v50  ;;  %v3038_v27 = vadd.s32 208, %v2907_v50  ;;  %v3041_v28 = vadd.s32 216, %v2907_v50 }
  0x8f   : > { %v294_v38 = vadd.f32 %v293_v34, %v292_v35  ;;  %v298_v39 = vmul.f32 0.5, %v1616_v36  ;;  %v301_v40 = vmul.f32 8.0, %v300_v37  ;;  %v3055_v29 = vadd.s32 224, %v2907_v50  ;;  %p2575_p5 = pnand %p2574_p11, %p2568_p6 }
  0x90   : > { %v3058_v30 = vadd.s32 232, %v2907_v50  ;;  %v3072_v31 = vadd.s32 240, %v2907_v50  ;;  %v3075_v32 = vadd.s32 248, %v2907_v50  ;;  %v3089_v33 = vadd.s32 256, %v2907_v50 }
  0x91   : > { %v2400_v41 = vcvt.f32.s32 %v298_v39  ;;  %v1617_v42 = vadd.f32 -1.0, %v301_v40  ;;  %v305_v43 = vadd.f32 1.0, %v294_v38  ;;  %v3092_v34 = vadd.s32 264, %v2907_v50 }
  0x92   : > { %v3106_v35 = vadd.s32 272, %v2907_v50  ;;  %v3109_v36 = vadd.s32 280, %v2907_v50  ;;  %v3123_v37 = vadd.s32 288, %v2907_v50  ;;  %v3126_v38 = vadd.s32 296, %v2907_v50 }
  0x93   : > { %v303_v44 = vmul.f32 0.5, %v1617_v42  ;;  %v306_v45 = vmul.f32 8.0, %v305_v43  ;;  %vm310_vm0 = vcmp.ge.s32.totalorder %v2400_v41, 0  ;;  %vm311_vm1 = vcmp.lt.s32.totalorder %v2400_v41, 8 }
  0x94   : > { %vm312_vm2 = vmand %vm310_vm0, %vm311_vm1  ;;  %v3140_v39 = vadd.s32 304, %v2907_v50  ;;  %v3143_v40 = vadd.s32 312, %v2907_v50  ;;  %v3160_v42 = vadd.s32 328, %v2907_v50  ;;  %v3174_v43 = vadd.s32 336, %v2907_v50 }
  0x95   : > { %v2403_v47 = vcvt.f32.s32 %v303_v44  ;;  %v1618_v48 = vadd.f32 -1.0, %v306_v45  ;;  %v3177_v44 = vadd.s32 344, %v2907_v50  ;;  %v3191_v45 = vadd.s32 352, %v2907_v50 }
  0x97   : > { %v308_v49 = vmul.f32 0.5, %v1618_v48  ;;  %vm313_vm3 = vcmp.ge.s32.totalorder %v2403_v47, 0  ;;  %vm315_vm4 = vcmp.lt.s32.totalorder %v2403_v47, 8  ;;  %v322_v52 = vmul.u32 8, %v2403_v47 }
  0x98   : > { %vm314_vm5 = vmand %vm312_vm2, %vm313_vm3  ;;  %v3208_v47 = vadd.s32 368, %v2907_v50  ;;  %v3211_v48 = vadd.s32 376, %v2907_v50 }
  0x99   : > { %v2406_v51 = vcvt.f32.s32 %v308_v49  ;;  %vm316_vm6 = vmand %vm314_vm5, %vm315_vm4  ;;  %v3225_v49 = vadd.s32 384, %v2907_v50 }
  0x9b   : > { %vm317_vm7 = vcmp.ge.s32.totalorder %v2406_v51, 0  ;;  %vm319_vm8 = vcmp.lt.s32.totalorder %v2406_v51, 8  ;;  %v321_v53 = vmul.u32 64, %v2406_v51  ;;  %v3228_v51 = vadd.s32 392, %v2907_v50 }
  0x9c   : > { %vm318_vm9 = vmand %vm316_vm6, %vm317_vm7 }
  0x9d   : > { %v323_v56 = vadd.s32 %v322_v52, %v321_v53  ;;  %vm320_vm10 = vmand %vm318_vm9, %vm319_vm8  ;;  %v3242_v52 = vadd.s32 400, %v2907_v50  ;;  %v3245_v53 = vadd.s32 408, %v2907_v50 }
  0x9f   : > { %v324_v0 = vadd.s32 %v2400_v41, %v323_v56  ;;  %v3157_v41 = vadd.s32 320, %v2907_v50  ;;  %v3276_v56 = vadd.s32 432, %v2907_v50 }
  0xa1   : > { %v325_v8 = vsel %vm320_vm10, %v324_v0, 4294967295  ;;  %v3344_v0 = vadd.s32 496, %v2907_v50 }
  0xa2   : > { %v2956_v12 = vrot.slane %v325_v8, %v397_v55  ;;  %v2958_v13 = vrot.slane %v325_v8, %v405_v57  ;;  %v2960_v14 = vrot.slane %v325_v8, %v393_v58  ;;  %v2962_v15 = vrot.slane %v325_v8, %v401_v59 }
  0xa3   : > { %v3262_v55 = vadd.s32 424, %v2907_v50  ;;  %v3279_v57 = vadd.s32 440, %v2907_v50  ;;  %v3293_v58 = vadd.s32 448, %v2907_v50  ;;  %v3296_v59 = vadd.s32 456, %v2907_v50 }
  0xa4   : > { %vm408_vm11 = vcmp.eq.s32.totalorder %v2907_v50, %v2956_v12  ;;  %vm412_vm12 = vcmp.eq.s32.totalorder %v328_v54, %v2956_v12  ;;  %vm410_vm13 = vcmp.eq.s32.totalorder %v2907_v50, %v2958_v13  ;;  %vm414_vm14 = vcmp.eq.s32.totalorder %v328_v54, %v2958_v13 }
  0xa5   : > { %vm2138_vm15 = vmpackc.low %vm412_vm12, %vm408_vm11  ;;  %vm407_vm0 = vcmp.eq.s32.totalorder %v2907_v50, %v2960_v14  ;;  %vm411_vm1 = vcmp.eq.s32.totalorder %v328_v54, %v2960_v14  ;;  %vm409_vm2 = vcmp.eq.s32.totalorder %v2907_v50, %v2962_v15  ;;  %vm413_vm3 = vcmp.eq.s32.totalorder %v328_v54, %v2962_v15 }
  0xa6   : > { %2139 = vmatprep.subr.msk.bf16.mxu0 %vm2138_vm15, %v2660_v20  ;;  %vm2266_vm4 = vmpackc.low %vm414_vm14, %vm410_vm13  ;;  %vm416_vm5 = vcmp.eq.s32.totalorder %v2915_v60, %v2956_v12  ;;  %vm420_vm6 = vcmp.eq.s32.totalorder %v2918_v61, %v2956_v12  ;;  %vm418_vm8 = vcmp.eq.s32.totalorder %v2915_v60, %v2958_v13  ;;  %vm422_vm9 = vcmp.eq.s32.totalorder %v2918_v61, %v2958_v13 }
  0xa7   : > { %2267 = vmatprep.subr.msk.bf16.mxu1 %vm2266_vm4, %v2660_v20  ;;  %vm2140_vm7 = vmpackc.low %vm411_vm1, %vm407_vm0  ;;  %vm415_vm11 = vcmp.eq.s32.totalorder %v2915_v60, %v2960_v14  ;;  %vm419_vm12 = vcmp.eq.s32.totalorder %v2918_v61, %v2960_v14  ;;  %vm417_vm14 = vcmp.eq.s32.totalorder %v2915_v60, %v2962_v15  ;;  %vm421_vm15 = vcmp.eq.s32.totalorder %v2918_v61, %v2962_v15 }
  0xa8   : > { %2141 = vmatpush1.bf16.msk.msra.mxu0 %vm2140_vm7, %v2660_v20  ;;  %vm2268_vm10 = vmpackc.low %vm413_vm3, %vm409_vm2  ;;  %vm424_vm1 = vcmp.eq.s32.totalorder %v2921_v62, %v2956_v12  ;;  %vm428_vm2 = vcmp.eq.s32.totalorder %v2924_v63, %v2956_v12  ;;  %vm426_vm4 = vcmp.eq.s32.totalorder %v2921_v62, %v2958_v13  ;;  %vm423_vm7 = vcmp.eq.s32.totalorder %v2921_v62, %v2960_v14 }
  0xa9   : > { %2269 = vmatpush1.bf16.msk.msra.mxu1 %vm2268_vm10, %v2660_v20  ;;  %vm2142_vm13 = vmpackc.low %vm420_vm6, %vm416_vm5  ;;  %vm430_vm5 = vcmp.eq.s32.totalorder %v2924_v63, %v2958_v13  ;;  %vm425_vm10 = vcmp.eq.s32.totalorder %v2921_v62, %v2962_v15  ;;  %v3259_v54 = vadd.s32 416, %v2907_v50  ;;  %v3310_v60 = vadd.s32 464, %v2907_v50 }
  0xaa   : > { %2143 = vmatprep.subr.msk.bf16.mxu0 %vm2142_vm13, %v2660_v20  ;;  %vm2270_vm0 = vmpackc.low %vm422_vm9, %vm418_vm8  ;;  %vm427_vm8 = vcmp.eq.s32.totalorder %v2924_v63, %v2960_v14  ;;  %vm432_vm13 = vcmp.eq.s32.totalorder %v2927_v1, %v2956_v12  ;;  %v3313_v61 = vadd.s32 472, %v2907_v50  ;;  %v3327_v62 = vadd.s32 480, %v2907_v50 }
  0xab   : > { %2271 = vmatprep.subr.msk.bf16.mxu1 %vm2270_vm0, %v2660_v20  ;;  %vm2144_vm3 = vmpackc.low %vm419_vm12, %vm415_vm11  ;;  %vm429_vm11 = vcmp.eq.s32.totalorder %v2924_v63, %v2962_v15  ;;  %vm434_vm0 = vcmp.eq.s32.totalorder %v2927_v1, %v2958_v13  ;;  %v3330_v63 = vadd.s32 488, %v2907_v50 }
  0xac   : > { %2145 = vmatpush1.bf16.msk.msra.mxu0 %vm2144_vm3, %v2660_v20  ;;  %vm2272_vm6 = vmpackc.low %vm421_vm15, %vm417_vm14  ;;  %vm436_vm14 = vcmp.eq.s32.totalorder %v2930_v2, %v2956_v12  ;;  %vm431_vm3 = vcmp.eq.s32.totalorder %v2927_v1, %v2960_v14 }
  0xad   : > { %2273 = vmatpush1.bf16.msk.msra.mxu1 %vm2272_vm6, %v2660_v20  ;;  %vm2146_vm9 = vmpackc.low %vm428_vm2, %vm424_vm1  ;;  %vm438_vm1 = vcmp.eq.s32.totalorder %v2930_v2, %v2958_v13  ;;  %vm433_vm6 = vcmp.eq.s32.totalorder %v2927_v1, %v2962_v15  ;;  %v3347_v1 = vadd.s32 504, %v2907_v50  ;;  %v4023_v50 = vld [vmem:[%s2879_s5 + $0x8] sm:$0xff] }
  0xae   : > { %2147 = vmatprep.subr.msk.bf16.mxu0 %vm2146_vm9, %v2660_v20  ;;  %vm2274_vm12 = vmpackc.low %vm430_vm5, %vm426_vm4  ;;  %vm435_vm4 = vcmp.eq.s32.totalorder %v2930_v2, %v2960_v14  ;;  %vm440_vm9 = vcmp.eq.s32.totalorder %v2933_v3, %v2956_v12 }
  0xaf   : > { %2275 = vmatprep.subr.msk.bf16.mxu1 %vm2274_vm12, %v2660_v20  ;;  %vm2148_vm15 = vmpackc.low %vm427_vm8, %vm423_vm7  ;;  %vm437_vm7 = vcmp.eq.s32.totalorder %v2930_v2, %v2962_v15  ;;  %vm442_vm12 = vcmp.eq.s32.totalorder %v2933_v3, %v2958_v13  ;;  %v1180_v2 = vcombine.high %v4023_v50, %v4023_v50 }
  0xb0   : > { %2149 = vmatpush1.bf16.msk.msra.mxu0 %vm2148_vm15, %v2660_v20  ;;  %vm2276_vm2 = vmpackc.low %vm429_vm11, %vm425_vm10  ;;  %vm444_vm10 = vcmp.eq.s32.totalorder %v2936_v4, %v2956_v12  ;;  %vm439_vm15 = vcmp.eq.s32.totalorder %v2933_v3, %v2960_v14 }
  0xb1   : > { %2277 = vmatpush1.bf16.msk.msra.mxu1 %vm2276_vm2, %v2660_v20  ;;  %vm2150_vm5 = vmpackc.low %vm436_vm14, %vm432_vm13  ;;  %vm446_vm13 = vcmp.eq.s32.totalorder %v2936_v4, %v2958_v13  ;;  %vm441_vm2 = vcmp.eq.s32.totalorder %v2933_v3, %v2962_v15  ;;  %v2493_v3 = vld [vmem:[%s2879_s5] sm:$0xff] }
  0xb2   : > { %2151 = vmatprep.subr.msk.bf16.mxu0 %vm2150_vm5, %v2660_v20  ;;  %vm2278_vm8 = vmpackc.low %vm438_vm1, %vm434_vm0  ;;  %vm443_vm0 = vcmp.eq.s32.totalorder %v2936_v4, %v2960_v14  ;;  %vm448_vm5 = vcmp.eq.s32.totalorder %v2939_v5, %v2956_v12 }
  0xb3   : > { %2279 = vmatprep.subr.msk.bf16.mxu1 %vm2278_vm8, %v2660_v20  ;;  %vm2152_vm11 = vmpackc.low %vm435_vm4, %vm431_vm3  ;;  %vm445_vm3 = vcmp.eq.s32.totalorder %v2936_v4, %v2962_v15  ;;  %vm450_vm8 = vcmp.eq.s32.totalorder %v2939_v5, %v2958_v13 }
  0xb4   : > { %2153 = vmatpush1.bf16.msk.msra.mxu0 %vm2152_vm11, %v2660_v20  ;;  %vm2280_vm14 = vmpackc.low %vm437_vm7, %vm433_vm6  ;;  %vm452_vm6 = vcmp.eq.s32.totalorder %v2942_v6, %v2956_v12  ;;  %vm447_vm11 = vcmp.eq.s32.totalorder %v2939_v5, %v2960_v14 }
  0xb5   : > { %2281 = vmatpush1.bf16.msk.msra.mxu1 %vm2280_vm14, %v2660_v20  ;;  %vm2154_vm1 = vmpackc.low %vm444_vm10, %vm440_vm9  ;;  %vm454_vm9 = vcmp.eq.s32.totalorder %v2942_v6, %v2958_v13  ;;  %vm449_vm14 = vcmp.eq.s32.totalorder %v2939_v5, %v2962_v15 }
  0xb6   : > { %2155 = vmatprep.subr.msk.bf16.mxu0 %vm2154_vm1, %v2660_v20  ;;  %vm2282_vm4 = vmpackc.low %vm446_vm13, %vm442_vm12  ;;  %vm451_vm12 = vcmp.eq.s32.totalorder %v2942_v6, %v2960_v14  ;;  %vm456_vm1 = vcmp.eq.s32.totalorder %v2945_v7, %v2956_v12 }
  0xb7   : > { %2283 = vmatprep.subr.msk.bf16.mxu1 %vm2282_vm4, %v2660_v20  ;;  %vm2156_vm7 = vmpackc.low %vm443_vm0, %vm439_vm15  ;;  %vm453_vm15 = vcmp.eq.s32.totalorder %v2942_v6, %v2962_v15  ;;  %vm458_vm4 = vcmp.eq.s32.totalorder %v2945_v7, %v2958_v13 }
  0xb8   : > { %2157 = vmatpush1.bf16.msk.msra.mxu0 %vm2156_vm7, %v2660_v20  ;;  %vm2284_vm10 = vmpackc.low %vm445_vm3, %vm441_vm2  ;;  %vm460_vm2 = vcmp.eq.s32.totalorder %v2948_v9, %v2956_v12  ;;  %vm455_vm7 = vcmp.eq.s32.totalorder %v2945_v7, %v2960_v14 }
  0xb9   : > { %2285 = vmatpush1.bf16.msk.msra.mxu1 %vm2284_vm10, %v2660_v20  ;;  %vm2158_vm13 = vmpackc.low %vm452_vm6, %vm448_vm5  ;;  %vm462_vm5 = vcmp.eq.s32.totalorder %v2948_v9, %v2958_v13  ;;  %vm461_vm10 = vcmp.eq.s32.totalorder %v2948_v9, %v2962_v15 }
  0xba   : > { %2159 = vmatprep.subr.msk.bf16.mxu0 %vm2158_vm13, %v2660_v20  ;;  %vm2286_vm0 = vmpackc.low %vm454_vm9, %vm450_vm8  ;;  %vm459_vm8 = vcmp.eq.s32.totalorder %v2948_v9, %v2960_v14  ;;  %vm457_vm9 = vcmp.eq.s32.totalorder %v2945_v7, %v2962_v15  ;;  %vm468_vm13 = vcmp.eq.s32.totalorder %v2954_v11, %v2956_v12 }
  0xbb   : > { %2287 = vmatprep.subr.msk.bf16.mxu1 %vm2286_vm0, %v2660_v20  ;;  %vm2160_vm3 = vmpackc.low %vm451_vm12, %vm447_vm11  ;;  %vm464_vm12 = vcmp.eq.s32.totalorder %v2951_v10, %v2956_v12 }
  0xbc   : > { %2161 = vmatpush1.bf16.msk.msra.mxu0 %vm2160_vm3, %v2660_v20  ;;  %vm2288_vm6 = vmpackc.low %vm453_vm15, %vm449_vm14  ;;  %vm466_vm14 = vcmp.eq.s32.totalorder %v2951_v10, %v2958_v13  ;;  %vm470_vm15 = vcmp.eq.s32.totalorder %v2954_v11, %v2958_v13 }
  0xbd   : > { %2289 = vmatpush1.bf16.msk.msra.mxu1 %vm2288_vm6, %v2660_v20  ;;  %vm2162_vm11 = vmpackc.low %vm460_vm2, %vm456_vm1  ;;  %vm463_vm1 = vcmp.eq.s32.totalorder %v2951_v10, %v2960_v14  ;;  %vm467_vm2 = vcmp.eq.s32.totalorder %v2954_v11, %v2960_v14 }
  0xbe   : > { %2163 = vmatprep.subr.msk.bf16.mxu0 %vm2162_vm11, %v2660_v20  ;;  %vm2290_vm0 = vmpackc.low %vm462_vm5, %vm458_vm4  ;;  %vm472_vm5 = vcmp.eq.s32.totalorder %v2965_v16, %v2956_v12  ;;  %vm476_vm11 = vcmp.eq.s32.totalorder %v2968_v17, %v2956_v12 }
  0xbf   : > { %2291 = vmatprep.subr.msk.bf16.mxu1 %vm2290_vm0, %v2660_v20  ;;  %vm2164_vm4 = vmpackc.low %vm459_vm8, %vm455_vm7  ;;  %vm471_vm8 = vcmp.eq.s32.totalorder %v2965_v16, %v2960_v14  ;;  %vm475_vm0 = vcmp.eq.s32.totalorder %v2968_v17, %v2960_v14 }
  0xc0   : > { %2165 = vmatpush1.bf16.msk.msra.mxu0 %vm2164_vm4, %v2660_v20  ;;  %vm2292_vm7 = vmpackc.low %vm461_vm10, %vm457_vm9  ;;  %vm480_vm10 = vcmp.eq.s32.totalorder %v2971_v18, %v2956_v12  ;;  %vm484_vm4 = vcmp.eq.s32.totalorder %v2974_v19, %v2956_v12 }
  0xc1   : > { %2293 = vmatpush1.bf16.msk.msra.mxu1 %vm2292_vm7, %v2660_v20  ;;  %vm2166_vm9 = vmpackc.low %vm468_vm13, %vm464_vm12  ;;  %vm479_vm13 = vcmp.eq.s32.totalorder %v2971_v18, %v2960_v14  ;;  %vm500_vm7 = vcmp.eq.s32.totalorder %v3008_v24, %v2956_v12 }
  0xc2   : > { %2167 = vmatprep.subr.msk.bf16.mxu0 %vm2166_vm9, %v2660_v20  ;;  %vm2294_vm12 = vmpackc.low %vm470_vm15, %vm466_vm14  ;;  %vm487_vm15 = vcmp.eq.s32.totalorder %v2994_v21, %v2960_v14  ;;  %vm491_vm9 = vcmp.eq.s32.totalorder %v2997_v22, %v2960_v14 }
  0xc3   : > { %2295 = vmatprep.subr.msk.bf16.mxu1 %vm2294_vm12, %v2660_v20  ;;  %vm2168_vm14 = vmpackc.low %vm467_vm2, %vm463_vm1  ;;  %vm4583_vm12 = vcmp.eq.s32.totalorder %v2951_v10, %v2962_v15  ;;  %vm4584_vm1 = vcmp.eq.s32.totalorder %v2954_v11, %v2962_v15 }
  0xc4   : > { %2169 = vmatpush1.bf16.msk.msra.mxu0 %vm2168_vm14, %v2660_v20  ;;  %vm2296_vm2 = vmpackc.low %vm4584_vm1, %vm4583_vm12  ;;  %vm496_vm14 = vcmp.eq.s32.totalorder %v3005_v23, %v2956_v12  ;;  %vm499_vm1 = vcmp.eq.s32.totalorder %v3008_v24, %v2960_v14 }
  0xc5   : > { %2297 = vmatpush1.bf16.msk.msra.mxu1 %vm2296_vm2, %v2660_v20  ;;  %vm2170_vm12 = vmpackc.low %vm476_vm11, %vm472_vm5  ;;  %vm4585_vm5 = vcmp.eq.s32.totalorder %v2965_v16, %v2958_v13  ;;  %vm4586_vm11 = vcmp.eq.s32.totalorder %v2968_v17, %v2958_v13 }
  0xc6   : > { %2171 = vmatprep.subr.msk.bf16.mxu0 %vm2170_vm12, %v2660_v20  ;;  %vm2298_vm6 = vmpackc.low %vm4586_vm11, %vm4585_vm5  ;;  %vm495_vm12 = vcmp.eq.s32.totalorder %v3005_v23, %v2960_v14 }
  0xc7   : > { %2299 = vmatprep.subr.msk.bf16.mxu1 %vm2298_vm6, %v2660_v20  ;;  %vm2172_vm5 = vmpackc.low %vm475_vm0, %vm471_vm8  ;;  %vm4587_vm8 = vcmp.eq.s32.totalorder %v2965_v16, %v2962_v15  ;;  %vm4588_vm0 = vcmp.eq.s32.totalorder %v2968_v17, %v2962_v15 }
  0xc8   : > { %2173 = vmatpush1.bf16.msk.msra.mxu0 %vm2172_vm5, %v2660_v20  ;;  %vm2300_vm3 = vmpackc.low %vm4588_vm0, %vm4587_vm8  ;;  %vm504_vm5 = vcmp.eq.s32.totalorder %v3021_v25, %v2956_v12 }
  0xc9   : > { %2301 = vmatpush1.bf16.msk.msra.mxu1 %vm2300_vm3, %v2660_v20  ;;  %vm2174_vm8 = vmpackc.low %vm484_vm4, %vm480_vm10  ;;  %vm4589_vm10 = vcmp.eq.s32.totalorder %v2971_v18, %v2958_v13  ;;  %vm4590_vm4 = vcmp.eq.s32.totalorder %v2974_v19, %v2958_v13  ;;  %vm516_vm3 = vcmp.eq.s32.totalorder %v3041_v28, %v2956_v12 }
  0xca   : > { %2175 = vmatprep.subr.msk.bf16.mxu0 %vm2174_vm8, %v2660_v20  ;;  %vm2302_vm2 = vmpackc.low %vm4590_vm4, %vm4589_vm10  ;;  %vm4591_vm10 = vcmp.eq.s32.totalorder %v2974_v19, %v2960_v14 }
  0xcb   : > { %2303 = vmatprep.subr.msk.bf16.mxu1 %vm2302_vm2, %v2660_v20  ;;  %vm2176_vm4 = vmpackc.low %vm4591_vm10, %vm479_vm13  ;;  %vm4592_vm13 = vcmp.eq.s32.totalorder %v2971_v18, %v2962_v15  ;;  %vm4593_vm10 = vcmp.eq.s32.totalorder %v2974_v19, %v2962_v15  ;;  %vm515_vm2 = vcmp.eq.s32.totalorder %v3041_v28, %v2960_v14 }
  0xcc   : > { %2177 = vmatpush1.bf16.msk.msra.mxu0 %vm2176_vm4, %v2660_v20  ;;  %vm2304_vm6 = vmpackc.low %vm4593_vm10, %vm4592_vm13  ;;  %vm4594_vm13 = vcmp.eq.s32.totalorder %v2994_v21, %v2956_v12  ;;  %vm4595_vm10 = vcmp.eq.s32.totalorder %v2997_v22, %v2956_v12  ;;  %vm512_vm4 = vcmp.eq.s32.totalorder %v3038_v27, %v2956_v12 }
  0xcd   : > { %2305 = vmatpush1.bf16.msk.msra.mxu1 %vm2304_vm6, %v2660_v20  ;;  %vm2178_vm0 = vmpackc.low %vm4595_vm10, %vm4594_vm13  ;;  %vm4596_vm13 = vcmp.eq.s32.totalorder %v2994_v21, %v2958_v13  ;;  %vm4597_vm10 = vcmp.eq.s32.totalorder %v2997_v22, %v2958_v13 }
  0xce   : > { %2179 = vmatprep.subr.msk.bf16.mxu0 %vm2178_vm0, %v2660_v20  ;;  %vm2306_vm11 = vmpackc.low %vm4597_vm10, %vm4596_vm13  ;;  %vm511_vm0 = vcmp.eq.s32.totalorder %v3038_v27, %v2960_v14  ;;  %vm524_vm10 = vcmp.eq.s32.totalorder %v3058_v30, %v2956_v12 }
  0xcf   : > { %2307 = vmatprep.subr.msk.bf16.mxu1 %vm2306_vm11, %v2660_v20  ;;  %vm2180_vm13 = vmpackc.low %vm491_vm9, %vm487_vm15  ;;  %vm4598_vm15 = vcmp.eq.s32.totalorder %v2994_v21, %v2962_v15  ;;  %vm4599_vm9 = vcmp.eq.s32.totalorder %v2997_v22, %v2962_v15 }
  0xd0   : > { %2181 = vmatpush1.bf16.msk.msra.mxu0 %vm2180_vm13, %v2660_v20  ;;  %vm2308_vm8 = vmpackc.low %vm4599_vm9, %vm4598_vm15  ;;  %vm520_vm13 = vcmp.eq.s32.totalorder %v3055_v29, %v2956_v12 }
  0xd1   : > { %2309 = vmatpush1.bf16.msk.msra.mxu1 %vm2308_vm8, %v2660_v20  ;;  %vm2182_vm15 = vmpackc.low %vm500_vm7, %vm496_vm14  ;;  %vm4600_vm7 = vcmp.eq.s32.totalorder %v3005_v23, %v2958_v13  ;;  %vm4601_vm14 = vcmp.eq.s32.totalorder %v3008_v24, %v2958_v13 }
  0xd2   : > { %2183 = vmatprep.subr.msk.bf16.mxu0 %vm2182_vm15, %v2660_v20  ;;  %vm2310_vm6 = vmpackc.low %vm4601_vm14, %vm4600_vm7  ;;  %vm519_vm15 = vcmp.eq.s32.totalorder %v3055_v29, %v2960_v14 }
  0xd3   : > { %2311 = vmatprep.subr.msk.bf16.mxu1 %vm2310_vm6, %v2660_v20  ;;  %vm2184_vm7 = vmpackc.low %vm499_vm1, %vm495_vm12  ;;  %vm4602_vm1 = vcmp.eq.s32.totalorder %v3005_v23, %v2962_v15  ;;  %vm4603_vm12 = vcmp.eq.s32.totalorder %v3008_v24, %v2962_v15  ;;  %vm531_vm6 = vcmp.eq.s32.totalorder %v3075_v32, %v2960_v14 }
  0xd4   : > { %2185 = vmatpush1.bf16.msk.msra.mxu0 %vm2184_vm7, %v2660_v20  ;;  %vm2312_vm11 = vmpackc.low %vm4603_vm12, %vm4602_vm1  ;;  %vm4604_vm1 = vcmp.eq.s32.totalorder %v3024_v26, %v2956_v12 }
  0xd5   : > { %2313 = vmatpush1.bf16.msk.msra.mxu1 %vm2312_vm11, %v2660_v20  ;;  %vm2186_vm12 = vmpackc.low %vm4604_vm1, %vm504_vm5  ;;  %vm4605_vm5 = vcmp.eq.s32.totalorder %v3021_v25, %v2958_v13  ;;  %vm4606_vm1 = vcmp.eq.s32.totalorder %v3024_v26, %v2958_v13  ;;  %vm628_vm11 = vcmp.eq.s32.totalorder %v3279_v57, %v2956_v12 }
  0xd6   : > { %2187 = vmatprep.subr.msk.bf16.mxu0 %vm2186_vm12, %v2660_v20  ;;  %vm2314_vm8 = vmpackc.low %vm4606_vm1, %vm4605_vm5  ;;  %vm4607_vm5 = vcmp.eq.s32.totalorder %v3021_v25, %v2960_v14  ;;  %vm4608_vm1 = vcmp.eq.s32.totalorder %v3024_v26, %v2960_v14  ;;  %vm527_vm12 = vcmp.eq.s32.totalorder %v3072_v31, %v2960_v14 }
  0xd7   : > { %2315 = vmatprep.subr.msk.bf16.mxu1 %vm2314_vm8, %v2660_v20  ;;  %vm2188_vm14 = vmpackc.low %vm4608_vm1, %vm4607_vm5  ;;  %vm4609_vm5 = vcmp.eq.s32.totalorder %v3021_v25, %v2962_v15  ;;  %vm4610_vm1 = vcmp.eq.s32.totalorder %v3024_v26, %v2962_v15  ;;  %vm4620_vm8 = vcmp.eq.s32.totalorder %v3072_v31, %v2956_v12 }
  0xd8   : > { %2189 = vmatpush1.bf16.msk.msra.mxu0 %vm2188_vm14, %v2660_v20  ;;  %vm2316_vm9 = vmpackc.low %vm4610_vm1, %vm4609_vm5  ;;  %vm529_vm1 = vcmp.eq.s32.totalorder %v3072_v31, %v2962_v15  ;;  %vm624_vm14 = vcmp.eq.s32.totalorder %v3276_v56, %v2956_v12 }
  0xd9   : > { %2317 = vmatpush1.bf16.msk.msra.mxu1 %vm2316_vm9, %v2660_v20  ;;  %vm2190_vm5 = vmpackc.low %vm516_vm3, %vm512_vm4  ;;  %vm4611_vm3 = vcmp.eq.s32.totalorder %v3038_v27, %v2958_v13  ;;  %vm4612_vm4 = vcmp.eq.s32.totalorder %v3041_v28, %v2958_v13  ;;  %vm4634_vm9 = vcmp.eq.s32.totalorder %v3109_v36, %v2956_v12 }
  0xda   : > { %2191 = vmatprep.subr.msk.bf16.mxu0 %vm2190_vm5, %v2660_v20  ;;  %vm2318_vm7 = vmpackc.low %vm4612_vm4, %vm4611_vm3  ;;  %vm632_vm3 = vcmp.eq.s32.totalorder %v3293_v58, %v2956_v12  ;;  %vm636_vm4 = vcmp.eq.s32.totalorder %v3296_v59, %v2956_v12 }
  0xdb   : > { %2319 = vmatprep.subr.msk.bf16.mxu1 %vm2318_vm7, %v2660_v20  ;;  %vm2192_vm5 = vmpackc.low %vm515_vm2, %vm511_vm0  ;;  %vm4613_vm7 = vcmp.eq.s32.totalorder %v3038_v27, %v2962_v15  ;;  %vm4614_vm2 = vcmp.eq.s32.totalorder %v3041_v28, %v2962_v15 }
  0xdc   : > { %2193 = vmatpush1.bf16.msk.msra.mxu0 %vm2192_vm5, %v2660_v20  ;;  %vm2320_vm0 = vmpackc.low %vm4614_vm2, %vm4613_vm7  ;;  %vm640_vm7 = vcmp.eq.s32.totalorder %v3310_v60, %v2956_v12  ;;  %vm660_vm2 = vcmp.eq.s32.totalorder %v3347_v1, %v2956_v12 }
  0xdd   : > { %2321 = vmatpush1.bf16.msk.msra.mxu1 %vm2320_vm0, %v2660_v20  ;;  %vm2194_vm5 = vmpackc.low %vm524_vm10, %vm520_vm13  ;;  %vm4615_vm0 = vcmp.eq.s32.totalorder %v3055_v29, %v2958_v13  ;;  %vm4616_vm10 = vcmp.eq.s32.totalorder %v3058_v30, %v2958_v13 }
  0xde   : > { %2195 = vmatprep.subr.msk.bf16.mxu0 %vm2194_vm5, %v2660_v20  ;;  %vm2322_vm13 = vmpackc.low %vm4616_vm10, %vm4615_vm0  ;;  %vm4617_vm5 = vcmp.eq.s32.totalorder %v3058_v30, %v2960_v14  ;;  %vm656_vm10 = vcmp.eq.s32.totalorder %v3344_v0, %v2956_v12 }
  0xdf   : > { %2323 = vmatprep.subr.msk.bf16.mxu1 %vm2322_vm13, %v2660_v20  ;;  %vm2196_vm0 = vmpackc.low %vm4617_vm5, %vm519_vm15  ;;  %vm4618_vm13 = vcmp.eq.s32.totalorder %v3055_v29, %v2962_v15  ;;  %vm4619_vm15 = vcmp.eq.s32.totalorder %v3058_v30, %v2962_v15 }
  0xe0   : > { %2197 = vmatpush1.bf16.msk.msra.mxu0 %vm2196_vm0, %v2660_v20  ;;  %vm2324_vm5 = vmpackc.low %vm4619_vm15, %vm4618_vm13  ;;  %vm4621_vm13 = vcmp.eq.s32.totalorder %v3075_v32, %v2956_v12  ;;  %vm4626_vm0 = vcmp.eq.s32.totalorder %v3092_v34, %v2956_v12 }
  0xe1   : > { %2325 = vmatpush1.bf16.msk.msra.mxu1 %vm2324_vm5, %v2660_v20  ;;  %vm2198_vm15 = vmpackc.low %vm4621_vm13, %vm4620_vm8  ;;  %vm4622_vm5 = vcmp.eq.s32.totalorder %v3072_v31, %v2958_v13  ;;  %vm4623_vm8 = vcmp.eq.s32.totalorder %v3075_v32, %v2958_v13 }
  0xe2   : > { %2199 = vmatprep.subr.msk.bf16.mxu0 %vm2198_vm15, %v2660_v20  ;;  %vm2326_vm13 = vmpackc.low %vm4623_vm8, %vm4622_vm5 }
  0xe3   : > { %2327 = vmatprep.subr.msk.bf16.mxu1 %vm2326_vm13, %v2660_v20  ;;  %vm2200_vm15 = vmpackc.low %vm531_vm6, %vm527_vm12  ;;  %vm4624_vm6 = vcmp.eq.s32.totalorder %v3075_v32, %v2962_v15  ;;  %vm4625_vm13 = vcmp.eq.s32.totalorder %v3089_v33, %v2956_v12 }
  0xe4   : > { %2201 = vmatpush1.bf16.msk.msra.mxu0 %vm2200_vm15, %v2660_v20  ;;  %vm2328_vm12 = vmpackc.low %vm4624_vm6, %vm529_vm1  ;;  %vm4627_vm15 = vcmp.eq.s32.totalorder %v3089_v33, %v2958_v13  ;;  %vm4628_vm1 = vcmp.eq.s32.totalorder %v3092_v34, %v2958_v13 }
  0xe5   : > { %2329 = vmatpush1.bf16.msk.msra.mxu1 %vm2328_vm12, %v2660_v20  ;;  %vm2202_vm8 = vmpackc.low %vm4626_vm0, %vm4625_vm13  ;;  %vm4629_vm12 = vcmp.eq.s32.totalorder %v3089_v33, %v2960_v14  ;;  %vm4630_vm0 = vcmp.eq.s32.totalorder %v3092_v34, %v2960_v14 }
  0xe6   : > { %2203 = vmatprep.subr.msk.bf16.mxu0 %vm2202_vm8, %v2660_v20  ;;  %vm2330_vm6 = vmpackc.low %vm4628_vm1, %vm4627_vm15  ;;  %vm4631_vm8 = vcmp.eq.s32.totalorder %v3089_v33, %v2962_v15  ;;  %vm4632_vm15 = vcmp.eq.s32.totalorder %v3092_v34, %v2962_v15 }
  0xe7   : > { %2331 = vmatprep.subr.msk.bf16.mxu1 %vm2330_vm6, %v2660_v20  ;;  %1248 = vmatmul.mubr.f32.vlgmr.msra.gmra.mrb[0].mxu0 %v2493_v3  ;;  %vm2204_vm13 = vmpackc.low %vm4630_vm0, %vm4629_vm12  ;;  %vm4633_vm6 = vcmp.eq.s32.totalorder %v3106_v35, %v2956_v12  ;;  %vm4635_vm12 = vcmp.eq.s32.totalorder %v3106_v35, %v2958_v13  ;;  %vm4636_vm0 = vcmp.eq.s32.totalorder %v3109_v36, %v2958_v13 }
  0xe8   : > { %2205 = vmatpush1.bf16.msk.msra.mxu0 %vm2204_vm13, %v2660_v20  ;;  %1390 = vmatmul.mubr.f32.vlgmr.msra.gmra.mrb[0].mxu1 %v2493_v3  ;;  %vm2332_vm1 = vmpackc.low %vm4632_vm15, %vm4631_vm8  ;;  %vm4637_vm8 = vcmp.eq.s32.totalorder %v3106_v35, %v2960_v14  ;;  %vm4638_vm15 = vcmp.eq.s32.totalorder %v3109_v36, %v2960_v14 }
  0xe9   : > { %2333 = vmatpush1.bf16.msk.msra.mxu1 %vm2332_vm1, %v2660_v20  ;;  %vm2206_vm5 = vmpackc.low %vm4634_vm9, %vm4633_vm6  ;;  %1318 = vmatprep.mubr.f32.mxu0 %v1180_v2  ;;  %vm4640_vm1 = vcmp.eq.s32.totalorder %v3109_v36, %v2962_v15 }
  0xea   : > { %2207 = vmatprep.subr.msk.bf16.mxu0 %vm2206_vm5, %v2660_v20  ;;  %vm2334_vm13 = vmpackc.low %vm4636_vm0, %vm4635_vm12  ;;  %1460 = vmatprep.mubr.f32.mxu1 %v1180_v2  ;;  %vm4639_vm5 = vcmp.eq.s32.totalorder %v3106_v35, %v2962_v15  ;;  %vm4641_vm12 = vcmp.eq.s32.totalorder %v3123_v37, %v2956_v12  ;;  %vm4642_vm0 = vcmp.eq.s32.totalorder %v3126_v38, %v2956_v12 }
  0xeb   : > { %2335 = vmatprep.subr.msk.bf16.mxu1 %vm2334_vm13, %v2660_v20  ;;  %vm2208_vm9 = vmpackc.low %vm4638_vm15, %vm4637_vm8  ;;  %vm4643_vm8 = vcmp.eq.s32.totalorder %v3123_v37, %v2958_v13  ;;  %vm4644_vm15 = vcmp.eq.s32.totalorder %v3126_v38, %v2958_v13 }
  0xec   : > { %2209 = vmatpush1.bf16.msk.msra.mxu0 %vm2208_vm9, %v2660_v20  ;;  %vm2336_vm6 = vmpackc.low %vm4640_vm1, %vm4639_vm5  ;;  %vm4645_vm5 = vcmp.eq.s32.totalorder %v3123_v37, %v2960_v14  ;;  %vm4646_vm1 = vcmp.eq.s32.totalorder %v3126_v38, %v2960_v14 }
  0xed   : > { %2337 = vmatpush1.bf16.msk.msra.mxu1 %vm2336_vm6, %v2660_v20  ;;  %vm2210_vm13 = vmpackc.low %vm4642_vm0, %vm4641_vm12  ;;  %vm4647_vm12 = vcmp.eq.s32.totalorder %v3123_v37, %v2962_v15  ;;  %vm4648_vm0 = vcmp.eq.s32.totalorder %v3126_v38, %v2962_v15 }
  0xee   : > { %2211 = vmatprep.subr.msk.bf16.mxu0 %vm2210_vm13, %v2660_v20  ;;  %vm2338_vm9 = vmpackc.low %vm4644_vm15, %vm4643_vm8  ;;  %vm4649_vm8 = vcmp.eq.s32.totalorder %v3140_v39, %v2956_v12  ;;  %vm4650_vm15 = vcmp.eq.s32.totalorder %v3143_v40, %v2956_v12 }
  0xef   : > { %2339 = vmatprep.subr.msk.bf16.mxu1 %vm2338_vm9, %v2660_v20  ;;  %vm2212_vm6 = vmpackc.low %vm4646_vm1, %vm4645_vm5  ;;  %vm4651_vm5 = vcmp.eq.s32.totalorder %v3140_v39, %v2958_v13  ;;  %vm4652_vm1 = vcmp.eq.s32.totalorder %v3143_v40, %v2958_v13 }
  0xf0   : > { %2213 = vmatpush1.bf16.msk.msra.mxu0 %vm2212_vm6, %v2660_v20  ;;  %vm2340_vm13 = vmpackc.low %vm4648_vm0, %vm4647_vm12  ;;  %vm4653_vm12 = vcmp.eq.s32.totalorder %v3140_v39, %v2960_v14  ;;  %vm4654_vm0 = vcmp.eq.s32.totalorder %v3143_v40, %v2960_v14 }
  0xf1   : > { %2341 = vmatpush1.bf16.msk.msra.mxu1 %vm2340_vm13, %v2660_v20  ;;  %vm2214_vm9 = vmpackc.low %vm4650_vm15, %vm4649_vm8  ;;  %vm4655_vm8 = vcmp.eq.s32.totalorder %v3140_v39, %v2962_v15  ;;  %vm4656_vm15 = vcmp.eq.s32.totalorder %v3143_v40, %v2962_v15 }
  0xf2   : > { %2215 = vmatprep.subr.msk.bf16.mxu0 %vm2214_vm9, %v2660_v20  ;;  %vm2342_vm6 = vmpackc.low %vm4652_vm1, %vm4651_vm5  ;;  %vm4657_vm5 = vcmp.eq.s32.totalorder %v3157_v41, %v2956_v12  ;;  %vm4658_vm1 = vcmp.eq.s32.totalorder %v3160_v42, %v2956_v12 }
  0xf3   : > { %2343 = vmatprep.subr.msk.bf16.mxu1 %vm2342_vm6, %v2660_v20  ;;  %vm2216_vm13 = vmpackc.low %vm4654_vm0, %vm4653_vm12  ;;  %vm4659_vm12 = vcmp.eq.s32.totalorder %v3157_v41, %v2958_v13  ;;  %vm4660_vm0 = vcmp.eq.s32.totalorder %v3160_v42, %v2958_v13 }
  0xf4   : > { %2217 = vmatpush1.bf16.msk.msra.mxu0 %vm2216_vm13, %v2660_v20  ;;  %vm2344_vm9 = vmpackc.low %vm4656_vm15, %vm4655_vm8  ;;  %vm4661_vm8 = vcmp.eq.s32.totalorder %v3157_v41, %v2960_v14  ;;  %vm4662_vm15 = vcmp.eq.s32.totalorder %v3160_v42, %v2960_v14 }
  0xf5   : > { %2345 = vmatpush1.bf16.msk.msra.mxu1 %vm2344_vm9, %v2660_v20  ;;  %vm2218_vm6 = vmpackc.low %vm4658_vm1, %vm4657_vm5  ;;  %vm4663_vm5 = vcmp.eq.s32.totalorder %v3157_v41, %v2962_v15  ;;  %vm4664_vm1 = vcmp.eq.s32.totalorder %v3160_v42, %v2962_v15 }
  0xf6   : > { %2219 = vmatprep.subr.msk.bf16.mxu0 %vm2218_vm6, %v2660_v20  ;;  %vm2346_vm13 = vmpackc.low %vm4660_vm0, %vm4659_vm12  ;;  %vm4665_vm12 = vcmp.eq.s32.totalorder %v3174_v43, %v2956_v12  ;;  %vm4666_vm0 = vcmp.eq.s32.totalorder %v3177_v44, %v2956_v12 }
  0xf7   : > { %2347 = vmatprep.subr.msk.bf16.mxu1 %vm2346_vm13, %v2660_v20  ;;  %vm2220_vm9 = vmpackc.low %vm4662_vm15, %vm4661_vm8  ;;  %vm4667_vm8 = vcmp.eq.s32.totalorder %v3174_v43, %v2958_v13  ;;  %vm4668_vm15 = vcmp.eq.s32.totalorder %v3177_v44, %v2958_v13 }
  0xf8   : > { %2221 = vmatpush1.bf16.msk.msra.mxu0 %vm2220_vm9, %v2660_v20  ;;  %vm2348_vm6 = vmpackc.low %vm4664_vm1, %vm4663_vm5  ;;  %vm4669_vm5 = vcmp.eq.s32.totalorder %v3174_v43, %v2960_v14  ;;  %vm4670_vm1 = vcmp.eq.s32.totalorder %v3177_v44, %v2960_v14 }
  0xf9   : > { %2349 = vmatpush1.bf16.msk.msra.mxu1 %vm2348_vm6, %v2660_v20  ;;  %vm2222_vm13 = vmpackc.low %vm4666_vm0, %vm4665_vm12  ;;  %vm4671_vm12 = vcmp.eq.s32.totalorder %v3174_v43, %v2962_v15  ;;  %vm4672_vm0 = vcmp.eq.s32.totalorder %v3177_v44, %v2962_v15 }
  0xfa   : > { %2223 = vmatprep.subr.msk.bf16.mxu0 %vm2222_vm13, %v2660_v20  ;;  %vm2350_vm9 = vmpackc.low %vm4668_vm15, %vm4667_vm8  ;;  %vm4673_vm8 = vcmp.eq.s32.totalorder %v3191_v45, %v2956_v12  ;;  %vm4674_vm15 = vcmp.eq.s32.totalorder %v3194_v46, %v2956_v12 }
  0xfb   : > { %2351 = vmatprep.subr.msk.bf16.mxu1 %vm2350_vm9, %v2660_v20  ;;  %vm2224_vm6 = vmpackc.low %vm4670_vm1, %vm4669_vm5  ;;  %vm4675_vm5 = vcmp.eq.s32.totalorder %v3191_v45, %v2958_v13  ;;  %vm4676_vm1 = vcmp.eq.s32.totalorder %v3194_v46, %v2958_v13 }
  0xfc   : > { %2225 = vmatpush1.bf16.msk.msra.mxu0 %vm2224_vm6, %v2660_v20  ;;  %vm2352_vm13 = vmpackc.low %vm4672_vm0, %vm4671_vm12  ;;  %vm4677_vm12 = vcmp.eq.s32.totalorder %v3191_v45, %v2960_v14  ;;  %vm4678_vm0 = vcmp.eq.s32.totalorder %v3194_v46, %v2960_v14 }
  0xfd   : > { %2353 = vmatpush1.bf16.msk.msra.mxu1 %vm2352_vm13, %v2660_v20  ;;  %vm2226_vm9 = vmpackc.low %vm4674_vm15, %vm4673_vm8  ;;  %vm4679_vm8 = vcmp.eq.s32.totalorder %v3191_v45, %v2962_v15  ;;  %vm4680_vm15 = vcmp.eq.s32.totalorder %v3194_v46, %v2962_v15 }
  0xfe   : > { %2227 = vmatprep.subr.msk.bf16.mxu0 %vm2226_vm9, %v2660_v20  ;;  %vm2354_vm6 = vmpackc.low %vm4676_vm1, %vm4675_vm5  ;;  %vm4681_vm5 = vcmp.eq.s32.totalorder %v3208_v47, %v2956_v12  ;;  %vm4682_vm1 = vcmp.eq.s32.totalorder %v3211_v48, %v2956_v12 }
  0xff   : > { %2355 = vmatprep.subr.msk.bf16.mxu1 %vm2354_vm6, %v2660_v20  ;;  %vm2228_vm13 = vmpackc.low %vm4678_vm0, %vm4677_vm12  ;;  %vm4683_vm12 = vcmp.eq.s32.totalorder %v3208_v47, %v2958_v13  ;;  %vm4684_vm0 = vcmp.eq.s32.totalorder %v3211_v48, %v2958_v13 }
 0x100   : > { %2229 = vmatpush1.bf16.msk.msra.mxu0 %vm2228_vm13, %v2660_v20  ;;  %vm2356_vm9 = vmpackc.low %vm4680_vm15, %vm4679_vm8  ;;  %vm4685_vm8 = vcmp.eq.s32.totalorder %v3208_v47, %v2960_v14  ;;  %vm4686_vm15 = vcmp.eq.s32.totalorder %v3211_v48, %v2960_v14 }
 0x101   : > { %2357 = vmatpush1.bf16.msk.msra.mxu1 %vm2356_vm9, %v2660_v20  ;;  %vm2230_vm6 = vmpackc.low %vm4682_vm1, %vm4681_vm5  ;;  %vm4687_vm5 = vcmp.eq.s32.totalorder %v3208_v47, %v2962_v15  ;;  %vm4688_vm1 = vcmp.eq.s32.totalorder %v3211_v48, %v2962_v15 }
 0x102   : > { %2231 = vmatprep.subr.msk.bf16.mxu0 %vm2230_vm6, %v2660_v20  ;;  %vm2358_vm13 = vmpackc.low %vm4684_vm0, %vm4683_vm12  ;;  %vm4689_vm12 = vcmp.eq.s32.totalorder %v3225_v49, %v2956_v12  ;;  %vm4690_vm0 = vcmp.eq.s32.totalorder %v3228_v51, %v2956_v12 }
 0x103   : > { %2359 = vmatprep.subr.msk.bf16.mxu1 %vm2358_vm13, %v2660_v20  ;;  %vm2232_vm9 = vmpackc.low %vm4686_vm15, %vm4685_vm8  ;;  %vm4691_vm8 = vcmp.eq.s32.totalorder %v3225_v49, %v2958_v13  ;;  %vm4692_vm15 = vcmp.eq.s32.totalorder %v3228_v51, %v2958_v13 }
 0x104   : > { %2233 = vmatpush1.bf16.msk.msra.mxu0 %vm2232_vm9, %v2660_v20  ;;  %vm2360_vm6 = vmpackc.low %vm4688_vm1, %vm4687_vm5  ;;  %vm4693_vm5 = vcmp.eq.s32.totalorder %v3225_v49, %v2960_v14  ;;  %vm4694_vm1 = vcmp.eq.s32.totalorder %v3228_v51, %v2960_v14 }
 0x105   : > { %2361 = vmatpush1.bf16.msk.msra.mxu1 %vm2360_vm6, %v2660_v20  ;;  %vm2234_vm13 = vmpackc.low %vm4690_vm0, %vm4689_vm12  ;;  %vm4695_vm12 = vcmp.eq.s32.totalorder %v3225_v49, %v2962_v15  ;;  %vm4696_vm0 = vcmp.eq.s32.totalorder %v3228_v51, %v2962_v15 }
 0x106   : > { %2235 = vmatprep.subr.msk.bf16.mxu0 %vm2234_vm13, %v2660_v20  ;;  %vm2362_vm9 = vmpackc.low %vm4692_vm15, %vm4691_vm8  ;;  %vm4697_vm8 = vcmp.eq.s32.totalorder %v3242_v52, %v2956_v12  ;;  %vm4698_vm15 = vcmp.eq.s32.totalorder %v3245_v53, %v2956_v12 }
 0x107   : > { %2363 = vmatprep.subr.msk.bf16.mxu1 %vm2362_vm9, %v2660_v20  ;;  %vm2236_vm6 = vmpackc.low %vm4694_vm1, %vm4693_vm5  ;;  %vm4699_vm5 = vcmp.eq.s32.totalorder %v3242_v52, %v2958_v13  ;;  %vm4700_vm1 = vcmp.eq.s32.totalorder %v3245_v53, %v2958_v13 }
 0x108   : > { %2237 = vmatpush1.bf16.msk.msra.mxu0 %vm2236_vm6, %v2660_v20  ;;  %vm2364_vm13 = vmpackc.low %vm4696_vm0, %vm4695_vm12  ;;  %vm4701_vm12 = vcmp.eq.s32.totalorder %v3242_v52, %v2960_v14  ;;  %vm4702_vm0 = vcmp.eq.s32.totalorder %v3245_v53, %v2960_v14 }
 0x109   : > { %2365 = vmatpush1.bf16.msk.msra.mxu1 %vm2364_vm13, %v2660_v20  ;;  %vm2238_vm9 = vmpackc.low %vm4698_vm15, %vm4697_vm8  ;;  %vm4703_vm8 = vcmp.eq.s32.totalorder %v3242_v52, %v2962_v15  ;;  %vm4704_vm15 = vcmp.eq.s32.totalorder %v3245_v53, %v2962_v15 }
 0x10a   : > { %2239 = vmatprep.subr.msk.bf16.mxu0 %vm2238_vm9, %v2660_v20  ;;  %vm2366_vm6 = vmpackc.low %vm4700_vm1, %vm4699_vm5  ;;  %vm4705_vm5 = vcmp.eq.s32.totalorder %v3259_v54, %v2956_v12  ;;  %vm4706_vm1 = vcmp.eq.s32.totalorder %v3262_v55, %v2956_v12 }
 0x10b   : > { %2367 = vmatprep.subr.msk.bf16.mxu1 %vm2366_vm6, %v2660_v20  ;;  %vm2240_vm13 = vmpackc.low %vm4702_vm0, %vm4701_vm12  ;;  %vm4707_vm12 = vcmp.eq.s32.totalorder %v3259_v54, %v2958_v13  ;;  %vm4708_vm0 = vcmp.eq.s32.totalorder %v3262_v55, %v2958_v13 }
 0x10c   : > { %2241 = vmatpush1.bf16.msk.msra.mxu0 %vm2240_vm13, %v2660_v20  ;;  %vm2368_vm9 = vmpackc.low %vm4704_vm15, %vm4703_vm8  ;;  %vm4709_vm8 = vcmp.eq.s32.totalorder %v3259_v54, %v2960_v14  ;;  %vm4710_vm15 = vcmp.eq.s32.totalorder %v3262_v55, %v2960_v14 }
 0x10d   : > { %2369 = vmatpush1.bf16.msk.msra.mxu1 %vm2368_vm9, %v2660_v20  ;;  %vm2242_vm6 = vmpackc.low %vm4706_vm1, %vm4705_vm5  ;;  %vm4711_vm5 = vcmp.eq.s32.totalorder %v3259_v54, %v2962_v15  ;;  %vm4712_vm1 = vcmp.eq.s32.totalorder %v3262_v55, %v2962_v15 }
 0x10e   : > { %2243 = vmatprep.subr.msk.bf16.mxu0 %vm2242_vm6, %v2660_v20  ;;  %vm2370_vm13 = vmpackc.low %vm4708_vm0, %vm4707_vm12  ;;  %vm4713_vm0 = vcmp.eq.s32.totalorder %v3276_v56, %v2958_v13 }
 0x10f   : > { %2371 = vmatprep.subr.msk.bf16.mxu1 %vm2370_vm13, %v2660_v20  ;;  %vm2244_vm9 = vmpackc.low %vm4710_vm15, %vm4709_vm8  ;;  %vm4714_vm13 = vcmp.eq.s32.totalorder %v3279_v57, %v2958_v13  ;;  %vm4715_vm15 = vcmp.eq.s32.totalorder %v3276_v56, %v2960_v14 }
 0x110   : > { %2245 = vmatpush1.bf16.msk.msra.mxu0 %vm2244_vm9, %v2660_v20  ;;  %vm2372_vm6 = vmpackc.low %vm4712_vm1, %vm4711_vm5  ;;  %vm4716_vm9 = vcmp.eq.s32.totalorder %v3279_v57, %v2960_v14 }
 0x111   : > { %2373 = vmatpush1.bf16.msk.msra.mxu1 %vm2372_vm6, %v2660_v20  ;;  %vm2246_vm12 = vmpackc.low %vm628_vm11, %vm624_vm14  ;;  %vm4717_vm11 = vcmp.eq.s32.totalorder %v3276_v56, %v2962_v15  ;;  %vm4718_vm14 = vcmp.eq.s32.totalorder %v3279_v57, %v2962_v15 }
 0x112   : > { %2247 = vmatprep.subr.msk.bf16.mxu0 %vm2246_vm12, %v2660_v20  ;;  %vm2374_vm8 = vmpackc.low %vm4714_vm13, %vm4713_vm0  ;;  %vm4719_vm12 = vcmp.eq.s32.totalorder %v3293_v58, %v2958_v13  ;;  %vm4720_vm0 = vcmp.eq.s32.totalorder %v3296_v59, %v2958_v13 }
 0x113   : > { %2375 = vmatprep.subr.msk.bf16.mxu1 %vm2374_vm8, %v2660_v20  ;;  %vm2248_vm5 = vmpackc.low %vm4716_vm9, %vm4715_vm15  ;;  %vm4721_vm8 = vcmp.eq.s32.totalorder %v3293_v58, %v2960_v14  ;;  %vm4722_vm15 = vcmp.eq.s32.totalorder %v3296_v59, %v2960_v14 }
 0x114   : > { %2249 = vmatpush1.bf16.msk.msra.mxu0 %vm2248_vm5, %v2660_v20  ;;  %vm2376_vm1 = vmpackc.low %vm4718_vm14, %vm4717_vm11  ;;  %vm4725_vm11 = vcmp.eq.s32.totalorder %v3313_v61, %v2956_v12 }
 0x115   : > { %2377 = vmatpush1.bf16.msk.msra.mxu1 %vm2376_vm1, %v2660_v20  ;;  %vm2250_vm6 = vmpackc.low %vm636_vm4, %vm632_vm3  ;;  %vm4723_vm3 = vcmp.eq.s32.totalorder %v3293_v58, %v2962_v15  ;;  %vm4724_vm4 = vcmp.eq.s32.totalorder %v3296_v59, %v2962_v15  ;;  %vm4726_vm1 = vcmp.eq.s32.totalorder %v3310_v60, %v2958_v13 }
 0x116   : > { %2251 = vmatprep.subr.msk.bf16.mxu0 %vm2250_vm6, %v2660_v20  ;;  %vm2378_vm13 = vmpackc.low %vm4720_vm0, %vm4719_vm12  ;;  %vm4727_vm6 = vcmp.eq.s32.totalorder %v3313_v61, %v2958_v13  ;;  %vm4728_vm0 = vcmp.eq.s32.totalorder %v3310_v60, %v2960_v14 }
 0x117   : > { %2379 = vmatprep.subr.msk.bf16.mxu1 %vm2378_vm13, %v2660_v20  ;;  %vm2252_vm9 = vmpackc.low %vm4722_vm15, %vm4721_vm8  ;;  %vm4729_vm13 = vcmp.eq.s32.totalorder %v3313_v61, %v2960_v14  ;;  %vm4731_vm15 = vcmp.eq.s32.totalorder %v3313_v61, %v2962_v15 }
 0x118   : > { %2253 = vmatpush1.bf16.msk.msra.mxu0 %vm2252_vm9, %v2660_v20  ;;  %vm2380_vm5 = vmpackc.low %vm4724_vm4, %vm4723_vm3  ;;  %vm4732_vm3 = vcmp.eq.s32.totalorder %v3327_v62, %v2956_v12  ;;  %vm4733_vm4 = vcmp.eq.s32.totalorder %v3330_v63, %v2956_v12 }
 0x119   : > { %2381 = vmatpush1.bf16.msk.msra.mxu1 %vm2380_vm5, %v2660_v20  ;;  %vm2254_vm14 = vmpackc.low %vm4725_vm11, %vm640_vm7  ;;  %vm4730_vm7 = vcmp.eq.s32.totalorder %v3310_v60, %v2962_v15  ;;  %vm4734_vm11 = vcmp.eq.s32.totalorder %v3327_v62, %v2958_v13 }
 0x11a   : > { %2255 = vmatprep.subr.msk.bf16.mxu0 %vm2254_vm14, %v2660_v20  ;;  %vm2382_vm12 = vmpackc.low %vm4727_vm6, %vm4726_vm1  ;;  %vm4735_vm14 = vcmp.eq.s32.totalorder %v3330_v63, %v2958_v13  ;;  %vm4736_vm6 = vcmp.eq.s32.totalorder %v3327_v62, %v2960_v14 }
 0x11b   : > { %2383 = vmatprep.subr.msk.bf16.mxu1 %vm2382_vm12, %v2660_v20  ;;  %vm2256_vm8 = vmpackc.low %vm4729_vm13, %vm4728_vm0  ;;  %vm4737_vm12 = vcmp.eq.s32.totalorder %v3330_v63, %v2960_v14  ;;  %vm4738_vm13 = vcmp.eq.s32.totalorder %v3327_v62, %v2962_v15 }
 0x11c   : > { %2257 = vmatpush1.bf16.msk.msra.mxu0 %vm2256_vm8, %v2660_v20  ;;  %vm2384_vm9 = vmpackc.low %vm4731_vm15, %vm4730_vm7  ;;  %vm4739_vm8 = vcmp.eq.s32.totalorder %v3330_v63, %v2962_v15 }
 0x11d   : > { %2385 = vmatpush1.bf16.msk.msra.mxu1 %vm2384_vm9, %v2660_v20  ;;  %vm2258_vm5 = vmpackc.low %vm4733_vm4, %vm4732_vm3  ;;  %vm4740_vm9 = vcmp.eq.s32.totalorder %v3344_v0, %v2958_v13  ;;  %vm4741_vm3 = vcmp.eq.s32.totalorder %v3347_v1, %v2958_v13 }
 0x11e   : > { %2259 = vmatprep.subr.msk.bf16.mxu0 %vm2258_vm5, %v2660_v20  ;;  %vm2386_vm1 = vmpackc.low %vm4735_vm14, %vm4734_vm11  ;;  %vm4742_vm5 = vcmp.eq.s32.totalorder %v3344_v0, %v2960_v14  ;;  %vm4743_vm11 = vcmp.eq.s32.totalorder %v3347_v1, %v2960_v14 }
 0x11f   : > { %2387 = vmatprep.subr.msk.bf16.mxu1 %vm2386_vm1, %v2660_v20  ;;  %vm2260_vm0 = vmpackc.low %vm4737_vm12, %vm4736_vm6 }
 0x120   : > { %2261 = vmatpush1.bf16.msk.msra.mxu0 %vm2260_vm0, %v2660_v20  ;;  %vm2388_vm7 = vmpackc.low %vm4739_vm8, %vm4738_vm13 }
 0x121   : > { %2389 = vmatpush1.bf16.msk.msra.mxu1 %vm2388_vm7, %v2660_v20  ;;  %vm2262_vm15 = vmpackc.low %vm660_vm2, %vm656_vm10  ;;  %vm4744_vm2 = vcmp.eq.s32.totalorder %v3344_v0, %v2962_v15  ;;  %vm4745_vm10 = vcmp.eq.s32.totalorder %v3347_v1, %v2962_v15 }
 0x122   : > { %2263 = vmatprep.subr.msk.bf16.mxu0 %vm2262_vm15, %v2660_v20  ;;  %vm2390_vm4 = vmpackc.low %vm4741_vm3, %vm4740_vm9 }
 0x123   : > { %2391 = vmatprep.subr.msk.bf16.mxu1 %vm2390_vm4, %v2660_v20  ;;  %vm2264_vm14 = vmpackc.low %vm4743_vm11, %vm4742_vm5 }
 0x124   : > { %2265 = vmatpush1.bf16.msk.msra.mxu0 %vm2264_vm14, %v2660_v20  ;;  %vm2392_vm1 = vmpackc.low %vm4745_vm10, %vm4744_vm2 }
 0x125   : > { %2393 = vmatpush1.bf16.msk.msra.mxu1 %vm2392_vm1, %v2660_v20 }
 0x127   : > { %1319 = vmatmul.mubr.f32.vlgmr.msra.gmra.mrb[0].mxu0 %v4023_v50 }
 0x128   : > { %1461 = vmatmul.mubr.f32.vlgmr.msra.gmra.mrb[0].mxu1 %v4023_v50 }
 0x1fa   : > { %v1320_v4 = vpop.f32.mrb[0].mxu0 }
 0x1fb   : > { %v1462_v5 = vpop.f32.mrb[0].mxu1  ;;  %v1322_v6 = vpop.f32.mrb[1].mxu0 }
 0x1fc   : > { %v1471_v7 = vcombine.low %v1320_v4, %v1322_v6  ;;  %v1464_v8 = vpop.f32.mrb[1].mxu1 }
 0x1fd   : > { %v1472_v9 = vcombine.low %v1462_v5, %v1464_v8 }
 0x1fe   : > { %1475 = vst [vmem:[%s233_s2] sm:$0xff] %v1471_v7 }
 0x1ff   : > { %1476 = vst [vmem:[%s233_s2 + $0x8] sm:$0xff] %v1472_v9 }
 0x200   : > { %2578 = shalt.err (!%p2575_p5)
}
 0x201   : > { %s2579_s7 = scalar_lea.hbm %s4507_s8, 256  ;;  %s2583_s9 = scalar_lea.hbm %s4559_s3, 512 }
 0x202   : > { %p2580_p10 = scmp.ne.s32.totalorder %s4507_s8, %s2579_s7  ;;  %p2584_p7 = scmp.lt.u32.totalorder %s4507_s8, %s4559_s3 }
 0x203   : > { %p2585_p12 = scmp.lt.u32.totalorder %s2583_s9, %s2579_s7  ;;  %p2587_p1 = scmp.lt.u32.totalorder %s2579_s7, %s4507_s8 }
 0x204   : > { %p2581_p13 = pnand %p2580_p10, %p2816_p8 }
 0x205   : > { %p2586_p2 = por %p2585_p12, %p2584_p7 }
 0x206   : > { %p2582_p3 = pneg %p2581_p13 }
 0x207   : > { %p2588_p4 = por %p2587_p1, %p2586_p2 }
 0x209   : > { %p2589_p6 = pnand %p2588_p4, %p2582_p3 }
 0x20b   : > { %2592 = shalt.err (!%p2589_p6)
}
 0x20c   : > { %2417 = dma.vmem_to_hbm [thread:$0]  (%p2816_p8), %s4509_s24, 256, %s4507_s8, %s1478_s15  }
 0x20d PF: > { %s1506_s29 = sand.u32 1, %s2635_s12   ;;  %p4747_p9 = scmp.ne.s32.totalorder %s4571_s23, 0 }
 0x20e   : > { %p4748_p0 = scmp.ge.s32.totalorder %s2655_s17, 2  ;;  %s1507_s30 = scalar_lea.sflag [#allocation4], %s1506_s29 }
 0x210   : > { %p2431_p11 = pnand %p4748_p0, %p4747_p9 }
 0x212   : > { %2630 = dma.done.wait (!%p2431_p11), %s1507_s30, 256  }
 0x213   : > { %2632 = vsyncadd (!%p2431_p11), %s1507_s30, 4294967040  ;;  %s21_s17 = sadd.s32 1, %s2655_s17   ;;  %s4749_s12 = smov %s2639_s13 }
 0x214   : > { %p18_p5 = scmp.ge.s32.totalorder %s21_s17, 4   ;;  %s4750_s13 = smov %s2643_s14 }
 0x215   : > { %s4751_s14 = smov %s2822_s19  ;;  %s4752_s15 = smov %s2651_s16 }
 0x216   : > { %s4753_s16 = smov %s4755_s28  ;;  %20 = sbr.rel (!%p18_p5) target bundleno = 12 (0xc), region = 90 }
 0x21d   :  { %1512 = vsyncpa [#allocation3], 1 }
 0x21e   :  { %1514 = vsyncpa [#allocation3 + $0x1], 1 }
 0x21f   :  { %1515 = vsyncpa [#allocation8], 1 }
 0x220   :  { %1517 = vsyncpa [#allocation8 + $0x1], 1 }
 0x221   :  { %1518 = vsyncpa [#allocation4], 1 }
 0x222   :  { %1520 = vsyncpa [#allocation4 + $0x1], 1 }
 0x223   :  { %1521 = vsyncpa [#allocation5], 1 }
 0x224   :  { %1523 = vsyncpa [#allocation5 + $0x1], 1 }

</bundles_post_ra>
